<compile_context>
chip_gen: v7x
topology: tpu7x:2x2x1
jax: 0.10.0
libtpu: 0.0.40
codegen_flags: <defaults>
</compile_context>

<pallas_src>
import functools

import jax
import jax.numpy as jnp
from jax.experimental import pallas as pl
from jax.experimental.pallas import tpu as pltpu


def _round_up(x, m):
    return (x + m - 1) // m * m


def compute_conv_output_size(lin, kernel_size, stride=1, padding=0, dilation=1):
    return int((lin + 2 * padding - dilation * (kernel_size - 1) - 1) // stride + 1)


# --------------------------- fused forward kernel ----------------------------

def _alexnet_fused_kernel(x_ref, w1_ref, b1_ref, w2_ref, b2_ref, w3_ref, b3_ref,
                          fw1_ref, fb1_ref, fw2_ref, fb2_ref, hw_ref, hb_ref,
                          o_ref, *, conv_dims):
    """One grid step = one image.  Weights + intermediates stay in VMEM/vregs.

    Conv uses the flat full-width trick: with activations stored as (H*W, C)
    row-major, the valid conv output at flat position p = oh*W + ow is
        sum_{i,j} a[p + i*W + j, :] @ w[i, j]
    Positions with ow >= WO hold garbage (wrap into the next row) and are
    simply never read by the pooling step.  This yields one
    (span, Cin) @ (Cin, Cout) MXU product per kernel tap.
    """
    conv_refs = ((w1_ref, b1_ref), (w2_ref, b2_ref), (w3_ref, b3_ref))
    a = x_ref[0]                                             # (H*W, Cin) f32

    for (h, w, kh, kw), (wt_ref, b_ref) in zip(conv_dims, conv_refs):
        ho, wo = h - kh + 1, w - kw + 1
        hp, wp = ho // 2, wo // 2
        cout = wt_ref.shape[-1]
        span = (ho - 1) * w + wo                             # covers all valid rows

        acc = None
        for i in range(kh):
            for j in range(kw):
                off = i * w + j
                part = jnp.dot(a[off:off + span, :], wt_ref[i * kw + j],
                               preferred_element_type=jnp.float32)
                acc = part if acc is None else acc + part
        y = jnp.maximum(acc + b_ref[...], 0.0)               # bias + ReLU, (span, Cout) f32
        # TODO(synk): Dropout(0.2) after ReLU is an eval-mode identity here.

        # floor-mode 2x2 max pool, re-flattened to (HP*WP, Cout) for the next layer
        rows = []
        for ph in range(hp):
            r0 = y[(2 * ph) * w:(2 * ph) * w + 2 * wp, :]
            r1 = y[(2 * ph + 1) * w:(2 * ph + 1) * w + 2 * wp, :]
            m = jnp.maximum(r0, r1)                          # (2*WP, Cout)
            rows.append(jnp.max(m.reshape(wp, 2, cout), axis=1))   # pairwise width max
        a = rows[0] if hp == 1 else jnp.concatenate(rows, axis=0)  # (HP*WP, Cout) f32

    # Classifier.  NHWC flatten; fc1_w rows were permuted at init to match, so
    # no activation transpose is ever needed.
    feat = a if a.shape[0] == 1 else a.reshape(1, -1)
    feat = feat.astype(jnp.bfloat16)                         # one cast per fc layer
    h1 = jnp.dot(feat, fw1_ref[...], preferred_element_type=jnp.float32) + fb1_ref[...]
    h1 = jnp.maximum(h1, 0.0).astype(jnp.bfloat16)
    h2 = jnp.dot(h1, fw2_ref[...], preferred_element_type=jnp.float32) + fb2_ref[...]
    h2 = jnp.maximum(h2, 0.0).astype(jnp.bfloat16)
    # All task heads fused into one lane-dense (256, 128) matmul.
    logits = jnp.dot(h2, hw_ref[...], preferred_element_type=jnp.float32) + hb_ref[...]
    o_ref[0] = logits.astype(o_ref.dtype)                    # (1, Npad) lane-dense store


# ------------------------------ forward wrapper -------------------------------

_WEIGHT_NAMES = ("conv1_w", "conv1_b", "conv2_w", "conv2_b", "conv3_w", "conv3_b",
                 "fc1_w", "fc1_b", "fc2_w", "fc2_b", "head_w", "head_b")


def alexnet_forward(params, x_nchw, head_sizes):
    """head_sizes must be a static Python tuple of ints (baked via partial)."""
    n, cin, hh, ww = x_nchw.shape
    x = jnp.transpose(x_nchw, (0, 2, 3, 1)).reshape(n, hh * ww, cin).astype(jnp.float32)

    # Static conv geometry chain, derived from the (square) per-tap weight shapes.
    conv_dims = []
    h, w = hh, ww
    for name in ("conv1_w", "conv2_w", "conv3_w"):
        taps = params[name].shape[0]
        k = int(round(taps ** 0.5))
        assert k * k == taps
        conv_dims.append((h, w, k, k))
        h, w = (h - k + 1) // 2, (w - k + 1) // 2

    n_pad = params["head_w"].shape[1]

    def _const_spec(arr):
        zeros = (0,) * arr.ndim
        return pl.BlockSpec(arr.shape, lambda b, z=zeros: z)   # resident, fetched once

    kernel = functools.partial(_alexnet_fused_kernel, conv_dims=tuple(conv_dims))
    out = pl.pallas_call(
        kernel,
        out_shape=jax.ShapeDtypeStruct((n, 1, n_pad), jnp.float32),
        grid=(n,),
        in_specs=[pl.BlockSpec((1, hh * ww, cin), lambda b: (b, 0, 0))]
                 + [_const_spec(params[nm]) for nm in _WEIGHT_NAMES],
        out_specs=pl.BlockSpec((1, 1, n_pad), lambda b: (b, 0, 0)),
        compiler_params=pltpu.CompilerParams(
            dimension_semantics=("parallel",)),   # batch split across v7x's 2 TCs
    )(x, *[params[nm] for nm in _WEIGHT_NAMES])

    logits = out[:, 0, :]
    ys, off = [], 0
    for ncls in head_sizes:
        ys.append(logits[:, off:off + ncls])
        off += ncls
    return ys


# --------------------------------- params -------------------------------------

def init_params(key, ncha, size, mul, taskcla):
    """All weight layout work is done ONCE here (review item):
       * conv weights as per-tap matmul matrices (KH*KW, Cin, Cout) f32
       * fc / head weights pre-cast to bf16 (MXU operands), biases f32 (1, D)
       * fc1 rows pre-permuted from PyTorch CHW-flatten order to NHWC order
       * all task-head weights/biases pre-concatenated, zero-padded to 128 lanes."""
    c1, c2, c3 = round(64 * mul), round(128 * mul), round(256 * mul)
    k1, k2, k3 = size // 8, size // 10, 2
    s = compute_conv_output_size(size, k1) // 2
    s = compute_conv_output_size(s, k2) // 2
    s = compute_conv_output_size(s, k3) // 2
    fc_in = c3 * s * s
    fc_dim = round(2048 * mul)                # experiment == 'mixture5'

    keys = jax.random.split(key, 10 + 2 * len(taskcla))
    scale = 0.1

    def conv_init(kw_key, kb_key, k, cin, cout):
        w = scale * jax.random.normal(kw_key, (k, k, cin, cout), jnp.float32)
        b = scale * jax.random.normal(kb_key, (cout,), jnp.float32)
        return w.reshape(k * k, cin, cout), b.reshape(1, cout)

    conv1_w, conv1_b = conv_init(keys[0], keys[1], k1, ncha, c1)
    conv2_w, conv2_b = conv_init(keys[2], keys[3], k2, c1, c2)
    conv3_w, conv3_b = conv_init(keys[4], keys[5], k3, c2, c3)

    # fc1: permute rows from CHW-flatten to NHWC-flatten once.
    fc1_w_chw = scale * jax.random.normal(keys[6], (fc_in, fc_dim), jnp.float32)
    perm = jnp.arange(fc_in).reshape(c3, s, s).transpose(1, 2, 0).reshape(-1)
    fc1_w = fc1_w_chw[perm].astype(jnp.bfloat16)
    fc1_b = (scale * jax.random.normal(keys[7], (fc_dim,), jnp.float32)).reshape(1, fc_dim)
    fc2_w = (scale * jax.random.normal(keys[8], (fc_dim, fc_dim), jnp.float32)).astype(jnp.bfloat16)
    fc2_b = (scale * jax.random.normal(keys[9], (fc_dim,), jnp.float32)).reshape(1, fc_dim)

    head_ws, head_bs = [], []
    for idx, (_, ncls) in enumerate(taskcla):
        head_ws.append(scale * jax.random.normal(keys[10 + 2 * idx], (fc_dim, ncls), jnp.float32))
        head_bs.append(scale * jax.random.normal(keys[11 + 2 * idx], (ncls,), jnp.float32))
    head_w = jnp.concatenate(head_ws, axis=1)
    head_b = jnp.concatenate(head_bs, axis=0)
    n_total = head_w.shape[1]
    n_pad = _round_up(max(n_total, 1), 128)
    head_w = jnp.pad(head_w, ((0, 0), (0, n_pad - n_total))).astype(jnp.bfloat16)
    head_b = jnp.pad(head_b, (0, n_pad - n_total)).reshape(1, n_pad).astype(jnp.float32)

    return {
        "conv1_w": conv1_w, "conv1_b": conv1_b,
        "conv2_w": conv2_w, "conv2_b": conv2_b,
        "conv3_w": conv3_w, "conv3_b": conv3_b,
        "fc1_w": fc1_w, "fc1_b": fc1_b,
        "fc2_w": fc2_w, "fc2_b": fc2_b,
        "head_w": head_w, "head_b": head_b,
    }


# ----------------------- pure-JAX reference (for checking) --------------------

def _reference_forward(params, x_nchw, head_sizes):
    x = jnp.transpose(x_nchw, (0, 2, 3, 1)).astype(jnp.float32)       # NHWC
    for wn, bn in (("conv1_w", "conv1_b"), ("conv2_w", "conv2_b"), ("conv3_w", "conv3_b")):
        w = params[wn].astype(jnp.float32)                            # (k*k, cin, cout)
        taps, _, cout = w.shape
        k = int(round(taps ** 0.5))
        n, h, wd, _ = x.shape
        ho, wo = h - k + 1, wd - k + 1
        acc = jnp.zeros((n, ho, wo, cout), jnp.float32)
        for i in range(k):
            for j in range(k):
                acc = acc + jnp.einsum("nhwc,cd->nhwd", x[:, i:i + ho, j:j + wo, :],
                                       w[i * k + j], precision="highest")
        y = jax.nn.relu(acc + params[bn].astype(jnp.float32).reshape(1, 1, 1, cout))
        hp, wp = ho // 2, wo // 2
        x = y[:, :2 * hp, :2 * wp, :].reshape(n, hp, 2, wp, 2, cout).max(axis=(2, 4))
    n = x.shape[0]
    feat = x.reshape(n, -1)                                           # NHWC flatten
    h1 = jax.nn.relu(feat @ params["fc1_w"].astype(jnp.float32) + params["fc1_b"][0])
    h2 = jax.nn.relu(h1 @ params["fc2_w"].astype(jnp.float32) + params["fc2_b"][0])
    logits = h2 @ params["head_w"].astype(jnp.float32) + params["head_b"][0]
    ys, off = [], 0
    for ncls in head_sizes:
        ys.append(logits[:, off:off + ncls])
        off += ncls
    return ys


# ----------------------------------- main --------------------------------------

if __name__ == "__main__":
    # Config consistent with the module:
    #   args.inputsize = (4, 16, 16), args.mul = 0.125, experiment = 'mixture5',
    #   args.taskcla = [(0, 5), (1, 7)], batch = 2
    batch, ncha, size = 2, 4, 16
    mul = 0.125
    taskcla = [(0, 5), (1, 7)]

    key = jax.random.PRNGKey(0)
    kp, kx = jax.random.split(key)
    params = init_params(kp, ncha, size, mul, taskcla)
    x = jax.random.normal(kx, (batch, ncha, size, size), jnp.float32)

    head_sizes = tuple(ncls for _, ncls in taskcla)
    fwd = jax.jit(functools.partial(alexnet_forward, head_sizes=head_sizes))
    ys = jax.block_until_ready(fwd(params, x))

    # shape / finiteness checks + check against a pure-JAX reference
    ys_ref = _reference_forward(params, x, head_sizes)
    assert len(ys) == len(taskcla)
    for (t, ncls), y, yr in zip(taskcla, ys, ys_ref):
        assert y.shape == (batch, ncls), (y.shape, (batch, ncls))
        assert bool(jnp.all(jnp.isfinite(y)))
        # fc path uses bf16 MXU operands -> allow a loose tolerance
        assert bool(jnp.allclose(y, yr, atol=5e-2, rtol=5e-2)), (
            "mismatch vs reference", float(jnp.max(jnp.abs(y - yr))))

    print("KERNEL_OK")
</pallas_src>

<mosaic_0001>
module attributes {stable_mosaic.version = 11 : i64} {
  func.func @_alexnet_fused_kernel(%arg0: i32, %arg1: memref<1x256x4xf32, #tpu.memory_space<vmem>>, %arg2: memref<4x4x8xf32, #tpu.memory_space<vmem>>, %arg3: memref<1x8xf32, #tpu.memory_space<vmem>>, %arg4: memref<1x8x16xf32, #tpu.memory_space<vmem>>, %arg5: memref<1x16xf32, #tpu.memory_space<vmem>>, %arg6: memref<4x16x32xf32, #tpu.memory_space<vmem>>, %arg7: memref<1x32xf32, #tpu.memory_space<vmem>>, %arg8: memref<32x256xbf16, #tpu.memory_space<vmem>>, %arg9: memref<1x256xf32, #tpu.memory_space<vmem>>, %arg10: memref<256x256xbf16, #tpu.memory_space<vmem>>, %arg11: memref<1x256xf32, #tpu.memory_space<vmem>>, %arg12: memref<256x128xbf16, #tpu.memory_space<vmem>>, %arg13: memref<1x128xf32, #tpu.memory_space<vmem>>, %arg14: memref<1x1x128xf32, #tpu.memory_space<vmem>>) attributes {dimension_semantics = [#tpu.dimension_semantics<parallel>], iteration_bounds = array<i64: 2>, scalar_prefetch = 0 : i64, scratch_operands = 0 : i64, tpu.core_type = #tpu.core_type<tc>, window_params = [{transform_indices = @transform_0, window_bounds = array<i64: 1, 256, 4>}, {pipeline_mode = #tpu.pipeline_mode<synchronous>, transform_indices = @transform_1, window_bounds = array<i64: 4, 4, 8>}, {pipeline_mode = #tpu.pipeline_mode<synchronous>, transform_indices = @transform_2, window_bounds = array<i64: 1, 8>}, {pipeline_mode = #tpu.pipeline_mode<synchronous>, transform_indices = @transform_3, window_bounds = array<i64: 1, 8, 16>}, {pipeline_mode = #tpu.pipeline_mode<synchronous>, transform_indices = @transform_4, window_bounds = array<i64: 1, 16>}, {pipeline_mode = #tpu.pipeline_mode<synchronous>, transform_indices = @transform_5, window_bounds = array<i64: 4, 16, 32>}, {pipeline_mode = #tpu.pipeline_mode<synchronous>, transform_indices = @transform_6, window_bounds = array<i64: 1, 32>}, {pipeline_mode = #tpu.pipeline_mode<synchronous>, transform_indices = @transform_7, window_bounds = array<i64: 32, 256>}, {pipeline_mode = #tpu.pipeline_mode<synchronous>, transform_indices = @transform_8, window_bounds = array<i64: 1, 256>}, {pipeline_mode = #tpu.pipeline_mode<synchronous>, transform_indices = @transform_9, window_bounds = array<i64: 256, 256>}, {pipeline_mode = #tpu.pipeline_mode<synchronous>, transform_indices = @transform_10, window_bounds = array<i64: 1, 256>}, {pipeline_mode = #tpu.pipeline_mode<synchronous>, transform_indices = @transform_11, window_bounds = array<i64: 256, 128>}, {pipeline_mode = #tpu.pipeline_mode<synchronous>, transform_indices = @transform_12, window_bounds = array<i64: 1, 128>}, {transform_indices = @transform_13, window_bounds = array<i64: 1, 1, 128>}]} {
    %c0 = arith.constant 0 : index
    %c0_0 = arith.constant 0 : index
    %c0_1 = arith.constant 0 : index
    %0 = vector.load %arg1[%c0, %c0_0, %c0_1] : memref<1x256x4xf32, #tpu.memory_space<vmem>>, vector<1x256x4xf32>
    %1 = vector.shape_cast %0 : vector<1x256x4xf32> to vector<256x4xf32>
    %2 = vector.extract_strided_slice %1 {offsets = [0, 0], sizes = [239, 4], strides = [1, 1]} : vector<256x4xf32> to vector<239x4xf32>
    %c0_2 = arith.constant 0 : index
    %c0_3 = arith.constant 0 : index
    %c0_4 = arith.constant 0 : index
    %3 = vector.load %arg2[%c0_2, %c0_3, %c0_4] : memref<4x4x8xf32, #tpu.memory_space<vmem>>, vector<1x4x8xf32>
    %4 = vector.shape_cast %3 : vector<1x4x8xf32> to vector<4x8xf32>
    %cst = arith.constant dense<0.000000e+00> : vector<239x8xf32>
    %5 = tpu.matmul %2, %4, %cst {dimension_numbers = #tpu.dot_dimension_numbers<[1], [0], [0], [1], [0, 0, 1, 1], [], []>} : vector<239x4xf32>, vector<4x8xf32>, vector<239x8xf32> -> vector<239x8xf32>
    %6 = vector.extract_strided_slice %1 {offsets = [1, 0], sizes = [239, 4], strides = [1, 1]} : vector<256x4xf32> to vector<239x4xf32>
    %c1 = arith.constant 1 : index
    %c0_5 = arith.constant 0 : index
    %c0_6 = arith.constant 0 : index
    %7 = vector.load %arg2[%c1, %c0_5, %c0_6] : memref<4x4x8xf32, #tpu.memory_space<vmem>>, vector<1x4x8xf32>
    %8 = vector.shape_cast %7 : vector<1x4x8xf32> to vector<4x8xf32>
    %cst_7 = arith.constant dense<0.000000e+00> : vector<239x8xf32>
    %9 = tpu.matmul %6, %8, %cst_7 {dimension_numbers = #tpu.dot_dimension_numbers<[1], [0], [0], [1], [0, 0, 1, 1], [], []>} : vector<239x4xf32>, vector<4x8xf32>, vector<239x8xf32> -> vector<239x8xf32>
    %10 = arith.addf %5, %9 : vector<239x8xf32>
    %11 = vector.extract_strided_slice %1 {offsets = [16, 0], sizes = [239, 4], strides = [1, 1]} : vector<256x4xf32> to vector<239x4xf32>
    %c2 = arith.constant 2 : index
    %c0_8 = arith.constant 0 : index
    %c0_9 = arith.constant 0 : index
    %12 = vector.load %arg2[%c2, %c0_8, %c0_9] : memref<4x4x8xf32, #tpu.memory_space<vmem>>, vector<1x4x8xf32>
    %13 = vector.shape_cast %12 : vector<1x4x8xf32> to vector<4x8xf32>
    %cst_10 = arith.constant dense<0.000000e+00> : vector<239x8xf32>
    %14 = tpu.matmul %11, %13, %cst_10 {dimension_numbers = #tpu.dot_dimension_numbers<[1], [0], [0], [1], [0, 0, 1, 1], [], []>} : vector<239x4xf32>, vector<4x8xf32>, vector<239x8xf32> -> vector<239x8xf32>
    %15 = arith.addf %10, %14 : vector<239x8xf32>
    %16 = vector.extract_strided_slice %1 {offsets = [17, 0], sizes = [239, 4], strides = [1, 1]} : vector<256x4xf32> to vector<239x4xf32>
    %c3 = arith.constant 3 : index
    %c0_11 = arith.constant 0 : index
    %c0_12 = arith.constant 0 : index
    %17 = vector.load %arg2[%c3, %c0_11, %c0_12] : memref<4x4x8xf32, #tpu.memory_space<vmem>>, vector<1x4x8xf32>
    %18 = vector.shape_cast %17 : vector<1x4x8xf32> to vector<4x8xf32>
    %cst_13 = arith.constant dense<0.000000e+00> : vector<239x8xf32>
    %19 = tpu.matmul %16, %18, %cst_13 {dimension_numbers = #tpu.dot_dimension_numbers<[1], [0], [0], [1], [0, 0, 1, 1], [], []>} : vector<239x4xf32>, vector<4x8xf32>, vector<239x8xf32> -> vector<239x8xf32>
    %20 = arith.addf %15, %19 : vector<239x8xf32>
    %c0_14 = arith.constant 0 : index
    %c0_15 = arith.constant 0 : index
    %21 = vector.load %arg3[%c0_14, %c0_15] : memref<1x8xf32, #tpu.memory_space<vmem>>, vector<1x8xf32>
    %22 = vector.broadcast %21 : vector<1x8xf32> to vector<239x8xf32>
    %23 = arith.addf %20, %22 : vector<239x8xf32>
    %cst_16 = arith.constant 0.000000e+00 : f32
    %24 = vector.broadcast %cst_16 : f32 to vector<239x8xf32>
    %25 = arith.maximumf %23, %24 : vector<239x8xf32>
    %26 = vector.extract_strided_slice %25 {offsets = [0, 0], sizes = [14, 8], strides = [1, 1]} : vector<239x8xf32> to vector<14x8xf32>
    %27 = vector.extract_strided_slice %25 {offsets = [16, 0], sizes = [14, 8], strides = [1, 1]} : vector<239x8xf32> to vector<14x8xf32>
    %28 = arith.maximumf %26, %27 : vector<14x8xf32>
    %29 = vector.shape_cast %28 : vector<14x8xf32> to vector<7x2x8xf32>
    %cst_17 = arith.constant dense<0xFF800000> : vector<7x8xf32>
    %30 = vector.multi_reduction <maximumf>, %29, %cst_17 [1] : vector<7x2x8xf32> to vector<7x8xf32>
    %31 = vector.extract_strided_slice %25 {offsets = [32, 0], sizes = [14, 8], strides = [1, 1]} : vector<239x8xf32> to vector<14x8xf32>
    %32 = vector.extract_strided_slice %25 {offsets = [48, 0], sizes = [14, 8], strides = [1, 1]} : vector<239x8xf32> to vector<14x8xf32>
    %33 = arith.maximumf %31, %32 : vector<14x8xf32>
    %34 = vector.shape_cast %33 : vector<14x8xf32> to vector<7x2x8xf32>
    %cst_18 = arith.constant dense<0xFF800000> : vector<7x8xf32>
    %35 = vector.multi_reduction <maximumf>, %34, %cst_18 [1] : vector<7x2x8xf32> to vector<7x8xf32>
    %36 = vector.extract_strided_slice %25 {offsets = [64, 0], sizes = [14, 8], strides = [1, 1]} : vector<239x8xf32> to vector<14x8xf32>
    %37 = vector.extract_strided_slice %25 {offsets = [80, 0], sizes = [14, 8], strides = [1, 1]} : vector<239x8xf32> to vector<14x8xf32>
    %38 = arith.maximumf %36, %37 : vector<14x8xf32>
    %39 = vector.shape_cast %38 : vector<14x8xf32> to vector<7x2x8xf32>
    %cst_19 = arith.constant dense<0xFF800000> : vector<7x8xf32>
    %40 = vector.multi_reduction <maximumf>, %39, %cst_19 [1] : vector<7x2x8xf32> to vector<7x8xf32>
    %41 = vector.extract_strided_slice %25 {offsets = [96, 0], sizes = [14, 8], strides = [1, 1]} : vector<239x8xf32> to vector<14x8xf32>
    %42 = vector.extract_strided_slice %25 {offsets = [112, 0], sizes = [14, 8], strides = [1, 1]} : vector<239x8xf32> to vector<14x8xf32>
    %43 = arith.maximumf %41, %42 : vector<14x8xf32>
    %44 = vector.shape_cast %43 : vector<14x8xf32> to vector<7x2x8xf32>
    %cst_20 = arith.constant dense<0xFF800000> : vector<7x8xf32>
    %45 = vector.multi_reduction <maximumf>, %44, %cst_20 [1] : vector<7x2x8xf32> to vector<7x8xf32>
    %46 = vector.extract_strided_slice %25 {offsets = [128, 0], sizes = [14, 8], strides = [1, 1]} : vector<239x8xf32> to vector<14x8xf32>
    %47 = vector.extract_strided_slice %25 {offsets = [144, 0], sizes = [14, 8], strides = [1, 1]} : vector<239x8xf32> to vector<14x8xf32>
    %48 = arith.maximumf %46, %47 : vector<14x8xf32>
    %49 = vector.shape_cast %48 : vector<14x8xf32> to vector<7x2x8xf32>
    %cst_21 = arith.constant dense<0xFF800000> : vector<7x8xf32>
    %50 = vector.multi_reduction <maximumf>, %49, %cst_21 [1] : vector<7x2x8xf32> to vector<7x8xf32>
    %51 = vector.extract_strided_slice %25 {offsets = [160, 0], sizes = [14, 8], strides = [1, 1]} : vector<239x8xf32> to vector<14x8xf32>
    %52 = vector.extract_strided_slice %25 {offsets = [176, 0], sizes = [14, 8], strides = [1, 1]} : vector<239x8xf32> to vector<14x8xf32>
    %53 = arith.maximumf %51, %52 : vector<14x8xf32>
    %54 = vector.shape_cast %53 : vector<14x8xf32> to vector<7x2x8xf32>
    %cst_22 = arith.constant dense<0xFF800000> : vector<7x8xf32>
    %55 = vector.multi_reduction <maximumf>, %54, %cst_22 [1] : vector<7x2x8xf32> to vector<7x8xf32>
    %56 = vector.extract_strided_slice %25 {offsets = [192, 0], sizes = [14, 8], strides = [1, 1]} : vector<239x8xf32> to vector<14x8xf32>
    %57 = vector.extract_strided_slice %25 {offsets = [208, 0], sizes = [14, 8], strides = [1, 1]} : vector<239x8xf32> to vector<14x8xf32>
    %58 = arith.maximumf %56, %57 : vector<14x8xf32>
    %59 = vector.shape_cast %58 : vector<14x8xf32> to vector<7x2x8xf32>
    %cst_23 = arith.constant dense<0xFF800000> : vector<7x8xf32>
    %60 = vector.multi_reduction <maximumf>, %59, %cst_23 [1] : vector<7x2x8xf32> to vector<7x8xf32>
    %61 = tpu.concatenate %30, %35, %40, %45, %50, %55, %60 in 0 : vector<7x8xf32>, vector<7x8xf32>, vector<7x8xf32>, vector<7x8xf32>, vector<7x8xf32>, vector<7x8xf32>, vector<7x8xf32> -> vector<49x8xf32>
    %c0_24 = arith.constant 0 : index
    %c0_25 = arith.constant 0 : index
    %c0_26 = arith.constant 0 : index
    %62 = vector.load %arg4[%c0_24, %c0_25, %c0_26] : memref<1x8x16xf32, #tpu.memory_space<vmem>>, vector<1x8x16xf32>
    %63 = vector.shape_cast %62 : vector<1x8x16xf32> to vector<8x16xf32>
    %cst_27 = arith.constant dense<0.000000e+00> : vector<49x16xf32>
    %64 = tpu.matmul %61, %63, %cst_27 {dimension_numbers = #tpu.dot_dimension_numbers<[1], [0], [0], [1], [0, 0, 1, 1], [], []>} : vector<49x8xf32>, vector<8x16xf32>, vector<49x16xf32> -> vector<49x16xf32>
    %c0_28 = arith.constant 0 : index
    %c0_29 = arith.constant 0 : index
    %65 = vector.load %arg5[%c0_28, %c0_29] : memref<1x16xf32, #tpu.memory_space<vmem>>, vector<1x16xf32>
    %66 = vector.broadcast %65 : vector<1x16xf32> to vector<49x16xf32>
    %67 = arith.addf %64, %66 : vector<49x16xf32>
    %cst_30 = arith.constant 0.000000e+00 : f32
    %68 = vector.broadcast %cst_30 : f32 to vector<49x16xf32>
    %69 = arith.maximumf %67, %68 : vector<49x16xf32>
    %70 = vector.extract_strided_slice %69 {offsets = [0, 0], sizes = [6, 16], strides = [1, 1]} : vector<49x16xf32> to vector<6x16xf32>
    %71 = vector.extract_strided_slice %69 {offsets = [7, 0], sizes = [6, 16], strides = [1, 1]} : vector<49x16xf32> to vector<6x16xf32>
    %72 = arith.maximumf %70, %71 : vector<6x16xf32>
    %73 = vector.shape_cast %72 : vector<6x16xf32> to vector<3x2x16xf32>
    %cst_31 = arith.constant dense<0xFF800000> : vector<3x16xf32>
    %74 = vector.multi_reduction <maximumf>, %73, %cst_31 [1] : vector<3x2x16xf32> to vector<3x16xf32>
    %75 = vector.extract_strided_slice %69 {offsets = [14, 0], sizes = [6, 16], strides = [1, 1]} : vector<49x16xf32> to vector<6x16xf32>
    %76 = vector.extract_strided_slice %69 {offsets = [21, 0], sizes = [6, 16], strides = [1, 1]} : vector<49x16xf32> to vector<6x16xf32>
    %77 = arith.maximumf %75, %76 : vector<6x16xf32>
    %78 = vector.shape_cast %77 : vector<6x16xf32> to vector<3x2x16xf32>
    %cst_32 = arith.constant dense<0xFF800000> : vector<3x16xf32>
    %79 = vector.multi_reduction <maximumf>, %78, %cst_32 [1] : vector<3x2x16xf32> to vector<3x16xf32>
    %80 = vector.extract_strided_slice %69 {offsets = [28, 0], sizes = [6, 16], strides = [1, 1]} : vector<49x16xf32> to vector<6x16xf32>
    %81 = vector.extract_strided_slice %69 {offsets = [35, 0], sizes = [6, 16], strides = [1, 1]} : vector<49x16xf32> to vector<6x16xf32>
    %82 = arith.maximumf %80, %81 : vector<6x16xf32>
    %83 = vector.shape_cast %82 : vector<6x16xf32> to vector<3x2x16xf32>
    %cst_33 = arith.constant dense<0xFF800000> : vector<3x16xf32>
    %84 = vector.multi_reduction <maximumf>, %83, %cst_33 [1] : vector<3x2x16xf32> to vector<3x16xf32>
    %85 = tpu.concatenate %74, %79, %84 in 0 : vector<3x16xf32>, vector<3x16xf32>, vector<3x16xf32> -> vector<9x16xf32>
    %86 = vector.extract_strided_slice %85 {offsets = [0, 0], sizes = [5, 16], strides = [1, 1]} : vector<9x16xf32> to vector<5x16xf32>
    %c0_34 = arith.constant 0 : index
    %c0_35 = arith.constant 0 : index
    %c0_36 = arith.constant 0 : index
    %87 = vector.load %arg6[%c0_34, %c0_35, %c0_36] : memref<4x16x32xf32, #tpu.memory_space<vmem>>, vector<1x16x32xf32>
    %88 = vector.shape_cast %87 : vector<1x16x32xf32> to vector<16x32xf32>
    %cst_37 = arith.constant dense<0.000000e+00> : vector<5x32xf32>
    %89 = tpu.matmul %86, %88, %cst_37 {dimension_numbers = #tpu.dot_dimension_numbers<[1], [0], [0], [1], [0, 0, 1, 1], [], []>} : vector<5x16xf32>, vector<16x32xf32>, vector<5x32xf32> -> vector<5x32xf32>
    %90 = vector.extract_strided_slice %85 {offsets = [1, 0], sizes = [5, 16], strides = [1, 1]} : vector<9x16xf32> to vector<5x16xf32>
    %c1_38 = arith.constant 1 : index
    %c0_39 = arith.constant 0 : index
    %c0_40 = arith.constant 0 : index
    %91 = vector.load %arg6[%c1_38, %c0_39, %c0_40] : memref<4x16x32xf32, #tpu.memory_space<vmem>>, vector<1x16x32xf32>
    %92 = vector.shape_cast %91 : vector<1x16x32xf32> to vector<16x32xf32>
    %cst_41 = arith.constant dense<0.000000e+00> : vector<5x32xf32>
    %93 = tpu.matmul %90, %92, %cst_41 {dimension_numbers = #tpu.dot_dimension_numbers<[1], [0], [0], [1], [0, 0, 1, 1], [], []>} : vector<5x16xf32>, vector<16x32xf32>, vector<5x32xf32> -> vector<5x32xf32>
    %94 = arith.addf %89, %93 : vector<5x32xf32>
    %95 = vector.extract_strided_slice %85 {offsets = [3, 0], sizes = [5, 16], strides = [1, 1]} : vector<9x16xf32> to vector<5x16xf32>
    %c2_42 = arith.constant 2 : index
    %c0_43 = arith.constant 0 : index
    %c0_44 = arith.constant 0 : index
    %96 = vector.load %arg6[%c2_42, %c0_43, %c0_44] : memref<4x16x32xf32, #tpu.memory_space<vmem>>, vector<1x16x32xf32>
    %97 = vector.shape_cast %96 : vector<1x16x32xf32> to vector<16x32xf32>
    %cst_45 = arith.constant dense<0.000000e+00> : vector<5x32xf32>
    %98 = tpu.matmul %95, %97, %cst_45 {dimension_numbers = #tpu.dot_dimension_numbers<[1], [0], [0], [1], [0, 0, 1, 1], [], []>} : vector<5x16xf32>, vector<16x32xf32>, vector<5x32xf32> -> vector<5x32xf32>
    %99 = arith.addf %94, %98 : vector<5x32xf32>
    %100 = vector.extract_strided_slice %85 {offsets = [4, 0], sizes = [5, 16], strides = [1, 1]} : vector<9x16xf32> to vector<5x16xf32>
    %c3_46 = arith.constant 3 : index
    %c0_47 = arith.constant 0 : index
    %c0_48 = arith.constant 0 : index
    %101 = vector.load %arg6[%c3_46, %c0_47, %c0_48] : memref<4x16x32xf32, #tpu.memory_space<vmem>>, vector<1x16x32xf32>
    %102 = vector.shape_cast %101 : vector<1x16x32xf32> to vector<16x32xf32>
    %cst_49 = arith.constant dense<0.000000e+00> : vector<5x32xf32>
    %103 = tpu.matmul %100, %102, %cst_49 {dimension_numbers = #tpu.dot_dimension_numbers<[1], [0], [0], [1], [0, 0, 1, 1], [], []>} : vector<5x16xf32>, vector<16x32xf32>, vector<5x32xf32> -> vector<5x32xf32>
    %104 = arith.addf %99, %103 : vector<5x32xf32>
    %c0_50 = arith.constant 0 : index
    %c0_51 = arith.constant 0 : index
    %105 = vector.load %arg7[%c0_50, %c0_51] : memref<1x32xf32, #tpu.memory_space<vmem>>, vector<1x32xf32>
    %106 = vector.broadcast %105 : vector<1x32xf32> to vector<5x32xf32>
    %107 = arith.addf %104, %106 : vector<5x32xf32>
    %cst_52 = arith.constant 0.000000e+00 : f32
    %108 = vector.broadcast %cst_52 : f32 to vector<5x32xf32>
    %109 = arith.maximumf %107, %108 : vector<5x32xf32>
    %110 = vector.extract_strided_slice %109 {offsets = [0, 0], sizes = [2, 32], strides = [1, 1]} : vector<5x32xf32> to vector<2x32xf32>
    %111 = vector.extract_strided_slice %109 {offsets = [3, 0], sizes = [2, 32], strides = [1, 1]} : vector<5x32xf32> to vector<2x32xf32>
    %112 = arith.maximumf %110, %111 : vector<2x32xf32>
    %113 = vector.shape_cast %112 : vector<2x32xf32> to vector<1x2x32xf32>
    %cst_53 = arith.constant dense<0xFF800000> : vector<1x32xf32>
    %114 = vector.multi_reduction <maximumf>, %113, %cst_53 [1] : vector<1x2x32xf32> to vector<1x32xf32>
    %115 = arith.truncf %114 : vector<1x32xf32> to vector<1x32xbf16>
    %c0_54 = arith.constant 0 : index
    %c0_55 = arith.constant 0 : index
    %116 = vector.load %arg8[%c0_54, %c0_55] : memref<32x256xbf16, #tpu.memory_space<vmem>>, vector<32x256xbf16>
    %cst_56 = arith.constant dense<0.000000e+00> : vector<1x256xf32>
    %117 = tpu.matmul %115, %116, %cst_56 {dimension_numbers = #tpu.dot_dimension_numbers<[1], [0], [0], [1], [0, 0, 1, 1], [], []>} : vector<1x32xbf16>, vector<32x256xbf16>, vector<1x256xf32> -> vector<1x256xf32>
    %c0_57 = arith.constant 0 : index
    %c0_58 = arith.constant 0 : index
    %118 = vector.load %arg9[%c0_57, %c0_58] : memref<1x256xf32, #tpu.memory_space<vmem>>, vector<1x256xf32>
    %119 = arith.addf %117, %118 : vector<1x256xf32>
    %cst_59 = arith.constant 0.000000e+00 : f32
    %120 = vector.broadcast %cst_59 : f32 to vector<1x256xf32>
    %121 = arith.maximumf %119, %120 : vector<1x256xf32>
    %122 = arith.truncf %121 : vector<1x256xf32> to vector<1x256xbf16>
    %c0_60 = arith.constant 0 : index
    %c0_61 = arith.constant 0 : index
    %123 = vector.load %arg10[%c0_60, %c0_61] : memref<256x256xbf16, #tpu.memory_space<vmem>>, vector<256x256xbf16>
    %cst_62 = arith.constant dense<0.000000e+00> : vector<1x256xf32>
    %124 = tpu.matmul %122, %123, %cst_62 {dimension_numbers = #tpu.dot_dimension_numbers<[1], [0], [0], [1], [0, 0, 1, 1], [], []>} : vector<1x256xbf16>, vector<256x256xbf16>, vector<1x256xf32> -> vector<1x256xf32>
    %c0_63 = arith.constant 0 : index
    %c0_64 = arith.constant 0 : index
    %125 = vector.load %arg11[%c0_63, %c0_64] : memref<1x256xf32, #tpu.memory_space<vmem>>, vector<1x256xf32>
    %126 = arith.addf %124, %125 : vector<1x256xf32>
    %cst_65 = arith.constant 0.000000e+00 : f32
    %127 = vector.broadcast %cst_65 : f32 to vector<1x256xf32>
    %128 = arith.maximumf %126, %127 : vector<1x256xf32>
    %129 = arith.truncf %128 : vector<1x256xf32> to vector<1x256xbf16>
    %c0_66 = arith.constant 0 : index
    %c0_67 = arith.constant 0 : index
    %130 = vector.load %arg12[%c0_66, %c0_67] : memref<256x128xbf16, #tpu.memory_space<vmem>>, vector<256x128xbf16>
    %cst_68 = arith.constant dense<0.000000e+00> : vector<1x128xf32>
    %131 = tpu.matmul %129, %130, %cst_68 {dimension_numbers = #tpu.dot_dimension_numbers<[1], [0], [0], [1], [0, 0, 1, 1], [], []>} : vector<1x256xbf16>, vector<256x128xbf16>, vector<1x128xf32> -> vector<1x128xf32>
    %c0_69 = arith.constant 0 : index
    %c0_70 = arith.constant 0 : index
    %132 = vector.load %arg13[%c0_69, %c0_70] : memref<1x128xf32, #tpu.memory_space<vmem>>, vector<1x128xf32>
    %133 = arith.addf %131, %132 : vector<1x128xf32>
    %c0_71 = arith.constant 0 : index
    %c0_72 = arith.constant 0 : index
    %c0_73 = arith.constant 0 : index
    %134 = vector.load %arg14[%c0_71, %c0_72, %c0_73] : memref<1x1x128xf32, #tpu.memory_space<vmem>>, vector<1x1x128xf32>
    %135 = vector.shape_cast %134 : vector<1x1x128xf32> to vector<1x128xf32>
    %136 = vector.shape_cast %133 : vector<1x128xf32> to vector<1x1x128xf32>
    tpu.vector_store %arg14[%c0_71, %c0_72, %c0_73], %136 {strides = array<i32>} : memref<1x1x128xf32, #tpu.memory_space<vmem>>, vector<1x1x128xf32>,
    return
  }
  func.func @transform_0(%arg0: i32) -> (i32, i32, i32) {
    %c0_i32 = arith.constant 0 : i32
    %c0_i32_0 = arith.constant 0 : i32
    %c0_i32_1 = arith.constant 0 : i32
    return %arg0, %c0_i32, %c0_i32_0 : i32, i32, i32
  }
  func.func @transform_1(%arg0: i32) -> (i32, i32, i32) {
    %c0_i32 = arith.constant 0 : i32
    %c0_i32_0 = arith.constant 0 : i32
    %c0_i32_1 = arith.constant 0 : i32
    %c0_i32_2 = arith.constant 0 : i32
    return %c0_i32, %c0_i32_0, %c0_i32_1 : i32, i32, i32
  }
  func.func @transform_2(%arg0: i32) -> (i32, i32) {
    %c0_i32 = arith.constant 0 : i32
    %c0_i32_0 = arith.constant 0 : i32
    %c0_i32_1 = arith.constant 0 : i32
    return %c0_i32, %c0_i32_0 : i32, i32
  }
  func.func @transform_3(%arg0: i32) -> (i32, i32, i32) {
    %c0_i32 = arith.constant 0 : i32
    %c0_i32_0 = arith.constant 0 : i32
    %c0_i32_1 = arith.constant 0 : i32
    %c0_i32_2 = arith.constant 0 : i32
    return %c0_i32, %c0_i32_0, %c0_i32_1 : i32, i32, i32
  }
  func.func @transform_4(%arg0: i32) -> (i32, i32) {
    %c0_i32 = arith.constant 0 : i32
    %c0_i32_0 = arith.constant 0 : i32
    %c0_i32_1 = arith.constant 0 : i32
    return %c0_i32, %c0_i32_0 : i32, i32
  }
  func.func @transform_5(%arg0: i32) -> (i32, i32, i32) {
    %c0_i32 = arith.constant 0 : i32
    %c0_i32_0 = arith.constant 0 : i32
    %c0_i32_1 = arith.constant 0 : i32
    %c0_i32_2 = arith.constant 0 : i32
    return %c0_i32, %c0_i32_0, %c0_i32_1 : i32, i32, i32
  }
  func.func @transform_6(%arg0: i32) -> (i32, i32) {
    %c0_i32 = arith.constant 0 : i32
    %c0_i32_0 = arith.constant 0 : i32
    %c0_i32_1 = arith.constant 0 : i32
    return %c0_i32, %c0_i32_0 : i32, i32
  }
  func.func @transform_7(%arg0: i32) -> (i32, i32) {
    %c0_i32 = arith.constant 0 : i32
    %c0_i32_0 = arith.constant 0 : i32
    %c0_i32_1 = arith.constant 0 : i32
    return %c0_i32, %c0_i32_0 : i32, i32
  }
  func.func @transform_8(%arg0: i32) -> (i32, i32) {
    %c0_i32 = arith.constant 0 : i32
    %c0_i32_0 = arith.constant 0 : i32
    %c0_i32_1 = arith.constant 0 : i32
    return %c0_i32, %c0_i32_0 : i32, i32
  }
  func.func @transform_9(%arg0: i32) -> (i32, i32) {
    %c0_i32 = arith.constant 0 : i32
    %c0_i32_0 = arith.constant 0 : i32
    %c0_i32_1 = arith.constant 0 : i32
    return %c0_i32, %c0_i32_0 : i32, i32
  }
  func.func @transform_10(%arg0: i32) -> (i32, i32) {
    %c0_i32 = arith.constant 0 : i32
    %c0_i32_0 = arith.constant 0 : i32
    %c0_i32_1 = arith.constant 0 : i32
    return %c0_i32, %c0_i32_0 : i32, i32
  }
  func.func @transform_11(%arg0: i32) -> (i32, i32) {
    %c0_i32 = arith.constant 0 : i32
    %c0_i32_0 = arith.constant 0 : i32
    %c0_i32_1 = arith.constant 0 : i32
    return %c0_i32, %c0_i32_0 : i32, i32
  }
  func.func @transform_12(%arg0: i32) -> (i32, i32) {
    %c0_i32 = arith.constant 0 : i32
    %c0_i32_0 = arith.constant 0 : i32
    %c0_i32_1 = arith.constant 0 : i32
    return %c0_i32, %c0_i32_0 : i32, i32
  }
  func.func @transform_13(%arg0: i32) -> (i32, i32, i32) {
    %c0_i32 = arith.constant 0 : i32
    %c0_i32_0 = arith.constant 0 : i32
    %c0_i32_1 = arith.constant 0 : i32
    return %arg0, %c0_i32, %c0_i32_0 : i32, i32, i32
  }
}

</mosaic_0001>

<bundles_post_ra>
// kernel: alexnet_forward.1
= control target key start
LH: loop header
LB: loop body
LE: loop exit
PB: predicated region body
PF: predicated region fallthrough
CT: control target
= control target key end

     0   :  { %s4521_s25 = smov 0   ;;  %s5746_s0 = inlined_call_operand.vmem [shape: f32[2,256,4], index: 0, kind: input, shape index: {}]   ;;  %s5747_s1 = inlined_call_operand.vmem [shape: f32[4,4,8], index: 1, kind: input, shape index: {}]   ;;  %s5748_s2 = inlined_call_operand.vmem [shape: f32[1,8], index: 2, kind: input, shape index: {}]   ;;  %s5749_s3 = inlined_call_operand.vmem [shape: f32[1,8,16], index: 3, kind: input, shape index: {}]   ;;  %s5750_s4 = inlined_call_operand.vmem [shape: f32[1,16], index: 4, kind: input, shape index: {}]   ;;  %s5751_s5 = inlined_call_operand.vmem [shape: f32[4,16,32], index: 5, kind: input, shape index: {}]   ;;  %s5752_s6 = inlined_call_operand.vmem [shape: f32[1,32], index: 6, kind: input, shape index: {}]   ;;  %s5753_s7 = inlined_call_operand.vmem [shape: bf16[32,256], index: 7, kind: input, shape index: {}]   ;;  %s5754_s8 = inlined_call_operand.vmem [shape: f32[1,256], index: 8, kind: input, shape index: {}]   ;;  %s5755_s9 = inlined_call_operand.vmem [shape: bf16[256,256], index: 9, kind: input, shape index: {}]   ;;  %s5756_s10 = inlined_call_operand.vmem [shape: f32[1,256], index: 10, kind: input, shape index: {}]   ;;  %s5757_s11 = inlined_call_operand.vmem [shape: bf16[256,128], index: 11, kind: input, shape index: {}]   ;;  %s5758_s12 = inlined_call_operand.vmem [shape: f32[1,128], index: 12, kind: input, shape index: {}]   ;;  %s5759_s13 = inlined_call_operand.vmem [shape: f32[2,1,128], index: 13, kind: output, shape index: {}]  }
   0x1 LB: > { %s3641_s26 = sadd.s32 4294967295, %s4444_s25   ;;  %p3645_p0 = scmp.ge.s32.totalorder %s4444_s25, 1  ;;  %s4444_s25 = sphi %s4521_s25, %s23_s25  }
   0x2   : > { %p387_p1 = scmp.lt.s32.totalorder %s4444_s25, 3 }
   0x4   : > { %p388_p2 = pnand %p3645_p0, %p387_p1 }
   0x6   : > { %391 = sbr.rel (%p388_p2) target bundleno = 1662 (0x67e), region = 72 }
   0xd   : > { %v3648_v0 = vld [vmem:[%s5747_s1 + $0x4] sm:$0xf]  ;;  %vm624_vm0 = vcmask 1043456   ;;  %p429_p3 = scmp.lt.s32.totalorder %s3641_s26, 1  ;;  %v470_v1 = vld [vmem:[%s5747_s1] sm:$0xf] }
   0xe   : > { %4017 = vmatprep.subr.msk.mxu0 %vm624_vm0, %v3648_v0  ;;  %4268 = vmatprep.subr.msk.mxu1 %vm624_vm0, %v3648_v0  ;;  %vm503_vm1 = vcmask 1046528   ;;  %vm563_vm2 = vcmask 31744   ;;  %v3711_v19 = vld [vmem:[%s5747_s1 + $0x8] sm:$0xf]  ;;  %v4648_v42 = vld [vmem:[%s5747_s1 + $0xc] sm:$0xf] }
   0xf   : > { %4018 = vmatpush3.msk.msra.mxu0 %vm624_vm0, %v3648_v0  ;;  %s5784_s26 = smov (!%p429_p3, %s3641_s26), 1  ;;  %4269 = vmatpush3.msk.msra.mxu1 %vm624_vm0, %v3648_v0  ;;  %vm4447_vm3 = vmmov 0   ;;  %vm1732_vm4 = vcmask 58368   ;;  %vm2347_vm5 = vcmask 1041409   ;;  %vm2349_vm6 = vcmask 1042434  }
  0x10   : > { %4064 = vmatprep.subr.msk.mxu0 %vm624_vm0, %v470_v1  ;;  %s3850_s14 = sshll.u32 %s5784_s26, 8  ;;  %vm2351_vm7 = vcmask 1043459   ;;  %vm2353_vm8 = vcmask 1044484   ;;  %vm2355_vm9 = vcmask 1045509   ;;  %vm2357_vm10 = vcmask 1046534   ;;  %s436_s16 = scalar_lea.vmem %s5759_s13, %s5784_s26 }
  0x11   : > { %s4546_s17 = scalar_lea.vmem %s5746_s0, %s3850_s14  ;;  %vm2462_vm11 = vcmask 64512   ;;  %vm2381_vm12 = vcmask 1047559   ;;  %vm2445_vm13 = vcmask 1045504   ;;  %vm2447_vm14 = vcmask 1044480  }
  0x12   : > { %v438_v2 = vld [vmem:[%s4546_s17] sm:$0xff]  ;;  %v439_v3 = vld [vmem:[%s4546_s17 + $0x8] sm:$0xff]  ;;  %v4551_v4 = vld [vmem:[%s4546_s17 + $0x10] sm:$0xff]  ;;  %vm2450_vm15 = vcmask 1042432  }
  0x13   : > { %v504_v5 = vrot.slane %v438_v2, 1  ;;  %v505_v6 = vrot.slane %v439_v3, 1  ;;  %v507_v7 = vrot.slane %v4551_v4, 1  ;;  %v4555_v8 = vld [vmem:[%s4546_s17 + $0x18] sm:$0xff]  ;;  %v4558_v9 = vld [vmem:[%s4546_s17 + $0x20] sm:$0xff]  ;;  %v4561_v10 = vld [vmem:[%s4546_s17 + $0x28] sm:$0xff] }
  0x14   : > { %v509_v11 = vrot.slane %v4555_v8, 1  ;;  %v511_v12 = vrot.slane %v4558_v9, 1  ;;  %v513_v15 = vrot.slane %v4561_v10, 1  ;;  %v4569_v16 = vld [vmem:[%s4546_s17 + $0x30] sm:$0xff]  ;;  %v4576_v18 = vld [vmem:[%s4546_s17 + $0x38] sm:$0xff]  ;;  %v4594_v24 = vld [vmem:[%s4546_s17 + $0x40] sm:$0xff] }
  0x15   : > { %v506_v13 = vsel %vm503_vm1, %v504_v5, %v505_v6  ;;  %v508_v14 = vsel %vm503_vm1, %v505_v6, %v507_v7  ;;  %v515_v21 = vrot.slane %v4569_v16, 1  ;;  %v517_v23 = vrot.slane %v4576_v18, 1  ;;  %v4616_v29 = vld [vmem:[%s4546_s17 + $0x48] sm:$0xff]  ;;  %v4619_v30 = vld [vmem:[%s4546_s17 + $0x50] sm:$0xff]  ;;  %v4622_v31 = vld [vmem:[%s4546_s17 + $0x58] sm:$0xff] }
  0x16   : > { %4019 = vmatprep.mubr.msk.f32.mxu0 %vm563_vm2, %v506_v13  ;;  %v4573_v17 = vsel %vm503_vm1, %v507_v7, %v509_v11  ;;  %v4586_v20 = vsel %vm503_vm1, %v509_v11, %v511_v12  ;;  %v4590_v22 = vsel %vm503_vm1, %v511_v12, %v513_v15  ;;  %v519_v26 = vrot.slane %v4594_v24, 1  ;;  %v4625_v32 = vld [vmem:[%s4546_s17 + $0x60] sm:$0xff]  ;;  %v4628_v33 = vld [vmem:[%s4546_s17 + $0x68] sm:$0xff]  ;;  %v4631_v34 = vld [vmem:[%s4546_s17 + $0x70] sm:$0xff] }
  0x17   : > { %4020 = vmatmul.mubr.msk.f32.vlgmr.msra.gmra.mrb[0].mxu0 %vm563_vm2, %v508_v14  ;;  %v4602_v25 = vsel %vm503_vm1, %v513_v15, %v515_v21  ;;  %v4606_v27 = vsel %vm503_vm1, %v515_v21, %v517_v23  ;;  %v4634_v35 = vld [vmem:[%s4546_s17 + $0x78] sm:$0xff]  ;;  %v521_v36 = vrot.slane %v4616_v29, 1  ;;  %v523_v37 = vrot.slane %v4619_v30, 1  ;;  %v4689_v49 = vld [vmem:[%s4546_s17 + $0x80] sm:$0xff]  ;;  %v4698_v52 = vld [vmem:[%s4546_s17 + $0x88] sm:$0xff] }
  0x18   : > { %4065 = vmatpush3.msk.msra.mxu0 %vm624_vm0, %v470_v1  ;;  %4022 = vmatprep.mubr.msk.f32.mxu0 %vm563_vm2, %v4573_v17  ;;  %v4613_v28 = vsel %vm503_vm1, %v517_v23, %v519_v26  ;;  %v525_v38 = vrot.slane %v4622_v31, 1  ;;  %v527_v39 = vrot.slane %v4625_v32, 1  ;;  %v529_v40 = vrot.slane %v4628_v33, 1  ;;  %v4711_v55 = vld [vmem:[%s4546_s17 + $0x90] sm:$0xff]  ;;  %v4720_v58 = vld [vmem:[%s4546_s17 + $0x98] sm:$0xff]  ;;  %v4733_v61 = vld [vmem:[%s4546_s17 + $0xa0] sm:$0xff] }
  0x19   : > { %4111 = vmatprep.subr.msk.mxu0 %vm624_vm0, %v3711_v19  ;;  %v531_v41 = vrot.slane %v4631_v34, 1  ;;  %v533_v43 = vrot.slane %v4634_v35, 1  ;;  %v4656_v44 = vsel %vm503_vm1, %v519_v26, %v521_v36  ;;  %v4661_v45 = vsel %vm503_vm1, %v521_v36, %v523_v37  ;;  %v4742_v0 = vld [vmem:[%s4546_s17 + $0xa8] sm:$0xff]  ;;  %v4764_v7 = vld [vmem:[%s4546_s17 + $0xb8] sm:$0xff]  ;;  %v4777_v13 = vld [vmem:[%s4546_s17 + $0xc0] sm:$0xff] }
  0x1a   : > { %4031 = vmatprep.mubr.msk.f32.mxu1 %vm563_vm2, %v4656_v44  ;;  %v4670_v46 = vsel %vm503_vm1, %v523_v37, %v525_v38  ;;  %v4677_v47 = vsel %vm503_vm1, %v525_v38, %v527_v39  ;;  %v4684_v48 = vsel %vm503_vm1, %v527_v39, %v529_v40  ;;  %v535_v50 = vrot.slane %v4689_v49, 1  ;;  %v464_v26 = vld [vmem:[%s4546_s17 + $0xd0] sm:$0xff]  ;;  %v465_v38 = vld [vmem:[%s4546_s17 + $0xd8] sm:$0xff] }
  0x1b   : > { %4023 = vmatmul.mubr.msk.f32.gmra.mrb[2].mxu0 %vm563_vm2, %v4586_v20  ;;  %4032 = vmatmul.mubr.msk.f32.vlgmr.msra.gmra.mrb[0].mxu1 %vm563_vm2, %v4661_v45  ;;  %v4695_v51 = vsel %vm503_vm1, %v529_v40, %v531_v41  ;;  %v537_v53 = vrot.slane %v4698_v52, 1  ;;  %v4706_v54 = vsel %vm503_vm1, %v531_v41, %v533_v43  ;;  %v539_v56 = vrot.slane %v4711_v55, 1  ;;  %v466_v41 = vld [vmem:[%s4546_s17 + $0xe0] sm:$0xff] }
  0x1c   : > { %4025 = vmatprep.mubr.msk.f32.mxu0 %vm563_vm2, %v4590_v22  ;;  %4034 = vmatprep.mubr.msk.f32.mxu1 %vm563_vm2, %v4670_v46  ;;  %v4717_v57 = vsel %vm503_vm1, %v533_v43, %v535_v50  ;;  %v541_v59 = vrot.slane %v4720_v58, 1  ;;  %v543_v62 = vrot.slane %v4733_v61, 1  ;;  %v545_v1 = vrot.slane %v4742_v0, 1 }
  0x1d   : > { %v4728_v60 = vsel %vm503_vm1, %v535_v50, %v537_v53  ;;  %v4739_v63 = vsel %vm503_vm1, %v537_v53, %v539_v56  ;;  %v549_v11 = vrot.slane %v4764_v7, 1  ;;  %v551_v14 = vrot.slane %v4777_v13, 1  ;;  %v467_v53 = vld [vmem:[%s4546_s17 + $0xe8] sm:$0xff] }
  0x1e   : > { %v4761_v6 = vsel %vm503_vm1, %v541_v59, %v543_v62  ;;  %v4772_v12 = vsel %vm503_vm1, %v543_v62, %v545_v1  ;;  %v555_v36 = vrot.slane %v464_v26, 1  ;;  %v557_v39 = vrot.slane %v465_v38, 1 }
  0x1f   : > { %4026 = vmatmul.mubr.msk.f32.gmra.mrb[4].mxu0 %vm563_vm2, %v4602_v25  ;;  %4035 = vmatmul.mubr.msk.f32.gmra.mrb[2].mxu1 %vm563_vm2, %v4677_v47  ;;  %v4802_v37 = vsel %vm503_vm1, %v549_v11, %v551_v14  ;;  %v559_v43 = vrot.slane %v466_v41, 1 }
  0x20   : > { %4028 = vmatprep.mubr.msk.f32.mxu0 %vm563_vm2, %v4606_v27  ;;  %4037 = vmatprep.mubr.msk.f32.mxu1 %vm563_vm2, %v4684_v48 }
  0x21   : > { %v4835_v62 = vsel %vm503_vm1, %v557_v39, %v559_v43 }
  0x23   : > { %4029 = vmatmul.mubr.msk.f32.gmra.mrb[6].mxu0 %vm563_vm2, %v4613_v28  ;;  %4038 = vmatmul.mubr.msk.f32.gmra.mrb[4].mxu1 %vm563_vm2, %v4695_v51 }
  0x24   : > { %4066 = vmatprep.mubr.msk.f32.mxu0 %vm563_vm2, %v438_v2  ;;  %4040 = vmatprep.mubr.msk.f32.mxu1 %vm563_vm2, %v4706_v54  ;;  %v4750_v2 = vsel %vm503_vm1, %v539_v56, %v541_v59  ;;  %v4825_v56 = vrot.slane %v467_v53, 1  ;;  %v4828_v59 = vsel %vm503_vm1, %v555_v36, %v557_v39 }
  0x27   : > { %4067 = vmatmul.mubr.msk.f32.vlgmr.msra.gmra.mrb[0].mxu0 %vm563_vm2, %v439_v3  ;;  %4041 = vmatmul.mubr.msk.f32.gmra.mrb[6].mxu1 %vm563_vm2, %v4717_v57  ;;  %v4755_v3 = vld [vmem:[%s4546_s17 + $0xb0] sm:$0xff] }
  0x28   : > { %4112 = vmatpush3.msk.msra.mxu0 %vm624_vm0, %v3711_v19  ;;  %4069 = vmatprep.mubr.msk.f32.mxu0 %vm563_vm2, %v4551_v4  ;;  %v547_v5 = vrot.slane %v4755_v3, 1  ;;  %v4786_v19 = vld [vmem:[%s4546_s17 + $0xc8] sm:$0xff] }
  0x29   : > { %4158 = vmatprep.subr.msk.mxu0 %vm624_vm0, %v4648_v42  ;;  %4043 = vmatprep.mubr.msk.f32.mxu1 %vm563_vm2, %v4728_v60  ;;  %v553_v21 = vrot.slane %v4786_v19, 1 }
  0x2a   : > { %v4783_v15 = vsel %vm503_vm1, %v545_v1, %v547_v5  ;;  %v4794_v23 = vsel %vm503_vm1, %v547_v5, %v549_v11  ;;  %v4843_v1 = vsel %vm503_vm1, %v559_v43, %v4825_v56 }
  0x2b   : > { %4070 = vmatmul.mubr.msk.f32.gmra.mrb[2].mxu0 %vm563_vm2, %v4555_v8  ;;  %4044 = vmatmul.mubr.msk.f32.gmra.mrb[8].mxu1 %vm563_vm2, %v4739_v63  ;;  %v4810_v40 = vsel %vm503_vm1, %v551_v14, %v553_v21  ;;  %v4818_v50 = vsel %vm503_vm1, %v553_v21, %v555_v36 }
  0x2c   : > { %4072 = vmatprep.mubr.msk.f32.mxu0 %vm563_vm2, %v4558_v9  ;;  %4046 = vmatprep.mubr.msk.f32.mxu1 %vm563_vm2, %v4750_v2 }
  0x2f   : > { %4073 = vmatmul.mubr.msk.f32.gmra.mrb[4].mxu0 %vm563_vm2, %v4561_v10  ;;  %4047 = vmatmul.mubr.msk.f32.gmra.mrb[10].mxu1 %vm563_vm2, %v4761_v6 }
  0x30   : > { %4075 = vmatprep.mubr.msk.f32.mxu0 %vm563_vm2, %v4569_v16  ;;  %4049 = vmatprep.mubr.msk.f32.mxu1 %vm563_vm2, %v4772_v12 }
  0x33   : > { %4076 = vmatmul.mubr.msk.f32.gmra.mrb[6].mxu0 %vm563_vm2, %v4576_v18  ;;  %4050 = vmatmul.mubr.msk.f32.gmra.mrb[12].mxu1 %vm563_vm2, %v4783_v15 }
  0x34   : > { %4078 = vmatprep.mubr.msk.f32.mxu0 %vm563_vm2, %v4594_v24  ;;  %4052 = vmatprep.mubr.msk.f32.mxu1 %vm563_vm2, %v4794_v23 }
  0x37   : > { %4079 = vmatmul.mubr.msk.f32.gmra.mrb[8].mxu0 %vm563_vm2, %v4616_v29  ;;  %4053 = vmatmul.mubr.msk.f32.gmra.mrb[14].mxu1 %vm563_vm2, %v4802_v37 }
  0x38   : > { %4081 = vmatprep.mubr.msk.f32.mxu0 %vm563_vm2, %v4619_v30  ;;  %4055 = vmatprep.mubr.msk.f32.mxu1 %vm563_vm2, %v4810_v40 }
  0x3b   : > { %4082 = vmatmul.mubr.msk.f32.gmra.mrb[10].mxu0 %vm563_vm2, %v4622_v31  ;;  %4056 = vmatmul.mubr.msk.f32.gmra.mrb[16].mxu1 %vm563_vm2, %v4818_v50 }
  0x3c   : > { %4084 = vmatprep.mubr.msk.f32.mxu0 %vm563_vm2, %v4625_v32  ;;  %4058 = vmatprep.mubr.msk.f32.mxu1 %vm563_vm2, %v4828_v59 }
  0x3f   : > { %4085 = vmatmul.mubr.msk.f32.gmra.mrb[12].mxu0 %vm563_vm2, %v4628_v33  ;;  %4059 = vmatmul.mubr.msk.f32.gmra.mrb[18].mxu1 %vm563_vm2, %v4835_v62 }
  0x40   : > { %4087 = vmatprep.mubr.msk.f32.mxu0 %vm563_vm2, %v4631_v34  ;;  %4061 = vmatprep.mubr.msk.f32.mxu1 %vm563_vm2, %v4843_v1 }
  0x43   : > { %4088 = vmatmul.mubr.msk.f32.gmra.mrb[14].mxu0 %vm563_vm2, %v4634_v35  ;;  %4062 = vmatmul.mubr.msk.f32.gmra.mrb[20].mxu1 %vm563_vm2, %v4825_v56 }
  0x44   : > { %4090 = vmatprep.mubr.msk.f32.mxu0 %vm563_vm2, %v4689_v49 }
  0x47   : > { %4091 = vmatmul.mubr.msk.f32.gmra.mrb[16].mxu0 %vm563_vm2, %v4698_v52 }
  0x48   : > { %4093 = vmatprep.mubr.msk.f32.mxu0 %vm563_vm2, %v4711_v55 }
  0x4b   : > { %4094 = vmatmul.mubr.msk.f32.gmra.mrb[18].mxu0 %vm563_vm2, %v4720_v58 }
  0x4c   : > { %4096 = vmatprep.mubr.msk.f32.mxu0 %vm563_vm2, %v4733_v61 }
  0x4f   : > { %4097 = vmatmul.mubr.msk.f32.gmra.mrb[20].mxu0 %vm563_vm2, %v4742_v0 }
  0x50   : > { %4099 = vmatprep.mubr.msk.f32.mxu0 %vm563_vm2, %v4755_v3 }
  0x53   : > { %4100 = vmatmul.mubr.msk.f32.gmra.mrb[22].mxu0 %vm563_vm2, %v4764_v7 }
  0x54   : > { %4102 = vmatprep.mubr.msk.f32.mxu0 %vm563_vm2, %v4777_v13 }
  0x57   : > { %4103 = vmatmul.mubr.msk.f32.gmra.mrb[24].mxu0 %vm563_vm2, %v4786_v19 }
  0x58   : > { %4105 = vmatprep.mubr.msk.f32.mxu0 %vm563_vm2, %v464_v26 }
  0x5b   : > { %4106 = vmatmul.mubr.msk.f32.gmra.mrb[26].mxu0 %vm563_vm2, %v465_v38 }
  0x5c   : > { %4108 = vmatprep.mubr.msk.f32.mxu0 %vm563_vm2, %v466_v41 }
  0x5f   : > { %4109 = vmatmul.mubr.msk.f32.gmra.mrb[28].mxu0 %vm563_vm2, %v467_v53 }
  0x60   : > { %4113 = vmatprep.mubr.msk.f32.mxu0 %vm563_vm2, %v4551_v4  ;;  %v4915_v4 = vld [vmem:[%s4546_s17 + $0xf0] sm:$0xff] }
  0x61   : > { %5768 = vst [vmem:[#allocation2_spill] sm:$0xff] %v4915_v4 }
  0x63   : > { %4114 = vmatmul.mubr.msk.f32.vlgmr.msra.gmra.mrb[0].mxu0 %vm563_vm2, %v4555_v8  ;;  %v469_v8 = vld [vmem:[%s4546_s17 + $0xf8] sm:$0xff] }
  0x64   : > { %4159 = vmatpush3.msk.msra.mxu0 %vm624_vm0, %v4648_v42  ;;  %4116 = vmatprep.mubr.msk.f32.mxu0 %vm563_vm2, %v4558_v9  ;;  %v5760_v9 = vrot.slane %v4915_v4, 1 }
  0x67   : > { %4117 = vmatmul.mubr.msk.f32.gmra.mrb[2].mxu0 %vm563_vm2, %v4561_v10  ;;  %v1372_v10 = vsel %vm503_vm1, %v4825_v56, %v5760_v9 }
  0x68   : > { %4119 = vmatprep.mubr.msk.f32.mxu0 %vm563_vm2, %v4569_v16 }
  0x6b   : > { %4120 = vmatmul.mubr.msk.f32.gmra.mrb[4].mxu0 %vm563_vm2, %v4576_v18 }
  0x6c   : > { %4122 = vmatprep.mubr.msk.f32.mxu0 %vm563_vm2, %v4594_v24 }
  0x6f   : > { %4123 = vmatmul.mubr.msk.f32.gmra.mrb[6].mxu0 %vm563_vm2, %v4616_v29 }
  0x70   : > { %4125 = vmatprep.mubr.msk.f32.mxu0 %vm563_vm2, %v4619_v30 }
  0x73   : > { %4126 = vmatmul.mubr.msk.f32.gmra.mrb[8].mxu0 %vm563_vm2, %v4622_v31 }
  0x74   : > { %4128 = vmatprep.mubr.msk.f32.mxu0 %vm563_vm2, %v4625_v32 }
  0x77   : > { %4129 = vmatmul.mubr.msk.f32.gmra.mrb[10].mxu0 %vm563_vm2, %v4628_v33 }
  0x78   : > { %4131 = vmatprep.mubr.msk.f32.mxu0 %vm563_vm2, %v4631_v34 }
  0x7b   : > { %4132 = vmatmul.mubr.msk.f32.gmra.mrb[12].mxu0 %vm563_vm2, %v4634_v35 }
  0x7c   : > { %4134 = vmatprep.mubr.msk.f32.mxu0 %vm563_vm2, %v4689_v49 }
  0x7f   : > { %4135 = vmatmul.mubr.msk.f32.gmra.mrb[14].mxu0 %vm563_vm2, %v4698_v52 }
  0x80   : > { %4137 = vmatprep.mubr.msk.f32.mxu0 %vm563_vm2, %v4711_v55 }
  0x83   : > { %4138 = vmatmul.mubr.msk.f32.gmra.mrb[16].mxu0 %vm563_vm2, %v4720_v58  ;;  %v4448_v58 = vmov 1983009808  }
  0x84   : > { %4140 = vmatprep.mubr.msk.f32.mxu0 %vm563_vm2, %v4733_v61  ;;  %v1696_v61 = vlaneseq }
  0x87   : > { %4141 = vmatmul.mubr.msk.f32.gmra.mrb[18].mxu0 %vm563_vm2, %v4742_v0  ;;  %v5031_v0 = vld [vmem:[%s5748_s2] ss:$0 sm:$0xff] }
  0x88   : > { %4143 = vmatprep.mubr.msk.f32.mxu0 %vm563_vm2, %v4755_v3 }
  0x8b   : > { %4144 = vmatmul.mubr.msk.f32.gmra.mrb[20].mxu0 %vm563_vm2, %v4764_v7 }
  0x8c   : > { %4146 = vmatprep.mubr.msk.f32.mxu0 %vm563_vm2, %v4777_v13 }
  0x8f   : > { %4147 = vmatmul.mubr.msk.f32.gmra.mrb[22].mxu0 %vm563_vm2, %v4786_v19 }
  0x90   : > { %4149 = vmatprep.mubr.msk.f32.mxu0 %vm563_vm2, %v464_v26 }
  0x93   : > { %4150 = vmatmul.mubr.msk.f32.gmra.mrb[24].mxu0 %vm563_vm2, %v465_v38 }
  0x94   : > { %4152 = vmatprep.mubr.msk.f32.mxu0 %vm563_vm2, %v466_v41 }
  0x97   : > { %4153 = vmatmul.mubr.msk.f32.gmra.mrb[26].mxu0 %vm563_vm2, %v467_v53 }
  0x98   : > { %4155 = vmatprep.mubr.msk.f32.mxu0 %vm563_vm2, %v4915_v4 }
  0x9b   : > { %4156 = vmatmul.mubr.msk.f32.gmra.mrb[30].mxu0 %vm563_vm2, %v469_v8 }
  0x9c   : > { %4160 = vmatprep.mubr.msk.f32.mxu0 %vm563_vm2, %v4573_v17 }
  0x9f   : > { %4161 = vmatmul.mubr.msk.f32.vlgmr.msra.gmra.mrb[0].mxu0 %vm563_vm2, %v4586_v20 }
  0xa0   : > { %4163 = vmatprep.mubr.msk.f32.mxu0 %vm563_vm2, %v4590_v22 }
  0xa3   : > { %4164 = vmatmul.mubr.msk.f32.gmra.mrb[2].mxu0 %vm563_vm2, %v4602_v25  ;;  %v5761_v25 = vmov 0.0  }
  0xa4   : > { %4166 = vmatprep.mubr.msk.f32.mxu0 %vm563_vm2, %v4606_v27  ;;  %4205 = vmatprep.subr.mxu1 %v5761_v25  ;;  %v2454_v27 = vld [vmem:[%s5749_s3] sm:$0xff] }
  0xa5   : > { %4206 = vmatpush3.msra.mxu1 %v2454_v27  ;;  %4207 = vmatprep.mubr.msk.f32.mxu1 %vm4447_vm3, %v5761_v25 }
  0xa7   : > { %4167 = vmatmul.mubr.msk.f32.gmra.mrb[4].mxu0 %vm563_vm2, %v4613_v28 }
  0xa8   : > { %4169 = vmatprep.mubr.msk.f32.mxu0 %vm563_vm2, %v4656_v44 }
  0xab   : > { %4170 = vmatmul.mubr.msk.f32.gmra.mrb[6].mxu0 %vm563_vm2, %v4661_v45 }
  0xac   : > { %4172 = vmatprep.mubr.msk.f32.mxu0 %vm563_vm2, %v4670_v46 }
  0xaf   : > { %4173 = vmatmul.mubr.msk.f32.gmra.mrb[8].mxu0 %vm563_vm2, %v4677_v47 }
  0xb0   : > { %4175 = vmatprep.mubr.msk.f32.mxu0 %vm563_vm2, %v4684_v48 }
  0xb3   : > { %4176 = vmatmul.mubr.msk.f32.gmra.mrb[10].mxu0 %vm563_vm2, %v4695_v51 }
  0xb4   : > { %4178 = vmatprep.mubr.msk.f32.mxu0 %vm563_vm2, %v4706_v54 }
  0xb7   : > { %4179 = vmatmul.mubr.msk.f32.gmra.mrb[12].mxu0 %vm563_vm2, %v4717_v57 }
  0xb8   : > { %4181 = vmatprep.mubr.msk.f32.mxu0 %vm563_vm2, %v4728_v60  ;;  %v1694_v60 = vunpack.c.l.s4 %v4448_v58 }
  0xba   : > { %v1695_v5 = vunpack.c.0.s8 %v1694_v60 }
  0xbb   : > { %4182 = vmatmul.mubr.msk.f32.gmra.mrb[14].mxu0 %vm563_vm2, %v4739_v63 }
  0xbc   : > { %4184 = vmatprep.mubr.msk.f32.mxu0 %vm563_vm2, %v4750_v2 }
  0xbf   : > { %4185 = vmatmul.mubr.msk.f32.gmra.mrb[16].mxu0 %vm563_vm2, %v4761_v6  ;;  %v5034_v6 = vshrl.u32 %v1696_v61, 7 }
  0xc0   : > { %4187 = vmatprep.mubr.msk.f32.mxu0 %vm563_vm2, %v4772_v12 }
  0xc1   : > { %5770 = vst [vmem:[#allocation4_spill] sm:$0xff] %v5034_v6  ;;  %v5040_v21 = vsub.s32 %v1695_v5, %v5034_v6 }
  0xc3   : > { %4188 = vmatmul.mubr.msk.f32.gmra.mrb[18].mxu0 %vm563_vm2, %v4783_v15 }
  0xc4   : > { %4190 = vmatprep.mubr.msk.f32.mxu0 %vm563_vm2, %v4794_v23 }
  0xc7   : > { %4191 = vmatmul.mubr.msk.f32.gmra.mrb[20].mxu0 %vm563_vm2, %v4802_v37 }
  0xc8   : > { %4193 = vmatprep.mubr.msk.f32.mxu0 %vm563_vm2, %v4810_v40 }
  0xcb   : > { %4194 = vmatmul.mubr.msk.f32.gmra.mrb[22].mxu0 %vm563_vm2, %v4818_v50 }
  0xcc   : > { %4196 = vmatprep.mubr.msk.f32.mxu0 %vm563_vm2, %v4828_v59 }
  0xcf   : > { %4197 = vmatmul.mubr.msk.f32.gmra.mrb[24].mxu0 %vm563_vm2, %v4835_v62 }
  0xd0   : > { %4199 = vmatprep.mubr.msk.f32.mxu0 %vm563_vm2, %v4843_v1 }
  0xd3   : > { %4200 = vmatmul.mubr.msk.f32.gmra.mrb[26].mxu0 %vm563_vm2, %v1372_v10 }
  0xee   : > { %v4982_v16 = vpop.f32.mrb[0].mxu1 }
  0xef   : > { %v4984_v17 = vpop.f32.mrb[1].mxu1 }
  0xf2   : > { %v4986_v18 = vpop.f32.mrb[2].mxu1 }
  0xf3   : > { %v4988_v20 = vpop.f32.mrb[3].mxu1 }
  0xf6   : > { %v4990_v22 = vpop.f32.mrb[4].mxu1 }
  0xf7   : > { %v4992_v24 = vpop.f32.mrb[5].mxu1 }
  0xfa   : > { %v4998_v28 = vpop.f32.mrb[6].mxu1 }
  0xfb   : > { %v5000_v29 = vpop.f32.mrb[7].mxu1 }
  0xfe   : > { %v5002_v30 = vpop.f32.mrb[8].mxu1 }
  0xff   : > { %v5004_v31 = vpop.f32.mrb[9].mxu1 }
 0x102   : > { %v5006_v32 = vpop.f32.mrb[10].mxu1 }
 0x103   : > { %v5010_v34 = vpop.f32.mrb[11].mxu1 }
 0x106   : > { %v5012_v42 = vpop.f32.mrb[12].mxu1 }
 0x107   : > { %v5014_v44 = vpop.f32.mrb[13].mxu1 }
 0x10a   : > { %v5016_v45 = vpop.f32.mrb[14].mxu1 }
 0x10b   : > { %v5018_v46 = vpop.f32.mrb[15].mxu1 }
 0x10e   : > { %v5020_v47 = vpop.f32.mrb[16].mxu1 }
 0x10f   : > { %v5022_v48 = vpop.f32.mrb[17].mxu1 }
 0x112   : > { %v5024_v49 = vpop.f32.mrb[18].mxu1 }
 0x113   : > { %v5026_v51 = vpop.f32.mrb[19].mxu1 }
 0x114   : > { %5769 = vst [vmem:[#allocation3_spill] sm:$0xff] %v5026_v51 }
 0x116   : > { %v4063_v52 = vpop.f32.mrb[20].mxu1 }
 0x117   : > { %v834_v54 = vpop.f32.mrb[21].mxu1 }
 0x132   : > { %v4110_v33 = vpop.f32.mrb[28].mxu0 }
 0x133   : > { %v1110_v35 = vpop.f32.mrb[29].mxu0 }
 0x16e   : > { %v4157_v55 = vpop.f32.mrb[30].mxu0 }
 0x16f   : > { %v1334_v57 = vpop.f32.mrb[31].mxu0 }
 0x172   : > { %v4162_v63 = vpop.f32.mrb[0].mxu0 }
 0x173   : > { %v1450_v2 = vpop.f32.mrb[1].mxu0  ;;  %v1633_v3 = vadd.f32 %v4162_v63, %v5031_v0 }
 0x174   : > { %v1632_v7 = vadd.f32 %v5031_v0, %v1450_v2 }
 0x175   : > { %v1661_v15 = vmax.f32 %v1633_v3, 0.0 }
 0x176   : > { %v4165_v11 = vpop.f32.mrb[2].mxu0  ;;  %v1660_v23 = vmax.f32 %v1632_v7, 0.0 }
 0x177   : > { %v1635_v12 = vadd.f32 %v4165_v11, %v5031_v0  ;;  %v1460_v13 = vpop.f32.mrb[3].mxu0 }
 0x178   : > { %v1634_v14 = vadd.f32 %v5031_v0, %v1460_v13 }
 0x179   : > { %v1663_v19 = vmax.f32 %v1635_v12, 0.0 }
 0x17a   : > { %v1662_v26 = vmax.f32 %v1634_v14, 0.0  ;;  %v4168_v36 = vpop.f32.mrb[4].mxu0 }
 0x17b   : > { %v1689_v37 = vmax.f32 %v1661_v15, %v1663_v19  ;;  %v1637_v38 = vadd.f32 %v4168_v36, %v5031_v0  ;;  %v1470_v39 = vpop.f32.mrb[5].mxu0 }
 0x17c   : > { %v1688_v40 = vmax.f32 %v1660_v23, %v1662_v26  ;;  %v5046_v59 = vadd.f32 %v5031_v0, %v1470_v39 }
 0x17d   : > { %v1709_v41 = vcombine.high %v1689_v37, %v1689_v37  ;;  %v1716_v43 = vrot.slane %v1689_v37, %v5040_v21  ;;  %v1665_v56 = vmax.f32 %v1637_v38, 0.0 }
 0x17e   : > { %v1692_v50 = vcombine.high %v1688_v40, %v1688_v40  ;;  %v1699_v53 = vrot.slane %v1688_v40, %v5040_v21  ;;  %v4171_v62 = vpop.f32.mrb[6].mxu0 }
 0x17f   : > { %v1723_v1 = vrot.slane %v1709_v41, %v5040_v21  ;;  %v1724_v8 = vcombine.high %v1716_v43, %v1716_v43  ;;  %v1761_v10 = vsel %vm1732_vm4, %v1716_v43, -inf  ;;  %v1639_v27 = vadd.f32 %v4171_v62, %v5031_v0  ;;  %v5051_v33 = vpop.f32.mrb[7].mxu0 }
 0x180   : > { %v1762_v35 = vrot.slane %v1761_v10, 4  ;;  %v1706_v52 = vrot.slane %v1692_v50, %v5040_v21  ;;  %v1707_v54 = vcombine.high %v1699_v53, %v1699_v53  ;;  %v1733_v55 = vsel %vm1732_vm4, %v1699_v53, -inf }
 0x181   : > { %v1768_v57 = vsel %vm1732_vm4, %v1724_v8, -inf  ;;  %v1775_v58 = vsel %vm1732_vm4, %v1723_v1, -inf  ;;  %v1734_v60 = vrot.slane %v1733_v55, 4  ;;  %v1667_v61 = vmax.f32 %v1639_v27, 0.0 }
 0x182   : > { %v1763_v63 = vmax.f32 %v1761_v10, %v1762_v35  ;;  %v1769_v2 = vrot.slane %v1768_v57, 4  ;;  %v1776_v3 = vrot.slane %v1775_v58, 4  ;;  %v1708_v5 = vcombine.high %v1706_v52, %v1706_v52  ;;  %v5057_v7 = vpop.f32.mrb[8].mxu0 }
 0x183   : > { %v1735_v11 = vmax.f32 %v1733_v55, %v1734_v60  ;;  %v1740_v12 = vsel %vm1732_vm4, %v1707_v54, -inf  ;;  %v1747_v13 = vsel %vm1732_vm4, %v1706_v52, -inf  ;;  %v1783_v14 = vmax.f32 %v1665_v56, %v1667_v61  ;;  %v5061_v15 = vpop.f32.mrb[9].mxu0 }
 0x184   : > { %v1764_v19 = vrot.slane %v1763_v63, 2  ;;  %v1770_v23 = vmax.f32 %v1768_v57, %v1769_v2  ;;  %v1777_v26 = vmax.f32 %v1775_v58, %v1776_v3  ;;  %v1741_v36 = vrot.slane %v1740_v12, 4 }
 0x185   : > { %v1736_v37 = vrot.slane %v1735_v11, 2  ;;  %v1748_v38 = vrot.slane %v1747_v13, 4  ;;  %v1754_v39 = vsel %vm1732_vm4, %v1708_v5, -inf  ;;  %v1803_v40 = vcombine.high %v1783_v14, %v1783_v14 }
 0x186   : > { %v1765_v41 = vmax.f32 %v1763_v63, %v1764_v19  ;;  %v1771_v43 = vrot.slane %v1770_v23, 2  ;;  %v1778_v50 = vrot.slane %v1777_v26, 2  ;;  %v1742_v53 = vmax.f32 %v1740_v12, %v1741_v36  ;;  %v4177_v62 = vpop.f32.mrb[10].mxu0 }
 0x187   : > { %v1737_v1 = vmax.f32 %v1735_v11, %v1736_v37  ;;  %v1749_v8 = vmax.f32 %v1747_v13, %v1748_v38  ;;  %v1755_v56 = vrot.slane %v1754_v39, 4  ;;  %v1810_v10 = vrot.slane %v1783_v14, %v5040_v21  ;;  %v1500_v27 = vpop.f32.mrb[11].mxu0 }
 0x188   : > { %v1766_v35 = vrot.slane %v1765_v41, 1  ;;  %v1772_v52 = vmax.f32 %v1770_v23, %v1771_v43  ;;  %v1779_v54 = vmax.f32 %v1777_v26, %v1778_v50  ;;  %v1743_v55 = vrot.slane %v1742_v53, 2 }
 0x189   : > { %v1738_v57 = vrot.slane %v1737_v1, 1  ;;  %v1750_v58 = vrot.slane %v1749_v8, 2  ;;  %v1756_v60 = vmax.f32 %v1754_v39, %v1755_v56  ;;  %v1664_v61 = vmax.f32 %v5046_v59, 0.0 }
 0x18a   : > { %v5066_v63 = vmax.f32 %v1765_v41, %v1766_v35  ;;  %v1773_v2 = vrot.slane %v1772_v52, 1  ;;  %v1744_v3 = vmax.f32 %v1742_v53, %v1743_v55  ;;  %v1817_v5 = vrot.slane %v1803_v40, %v5040_v21  ;;  %v5069_v11 = vpop.f32.mrb[12].mxu0 }
 0x18b   : > { %v1780_v12 = vrot.slane %v1779_v54, 1  ;;  %v1751_v13 = vmax.f32 %v1749_v8, %v1750_v58  ;;  %v1757_v14 = vrot.slane %v1756_v60, 2  ;;  %v1818_v19 = vcombine.high %v1810_v10, %v1810_v10  ;;  %v5071_v23 = vpop.f32.mrb[13].mxu0 }
 0x18c   : > { %v5073_v26 = vmax.f32 %v1772_v52, %v1773_v2  ;;  %v1739_v36 = vmax.f32 %v1737_v1, %v1738_v57  ;;  %v1745_v37 = vrot.slane %v1744_v3, 1  ;;  %v1854_v59 = vsel %vm1732_vm4, %v1810_v10, -inf }
 0x18d   : > { %v1752_v38 = vrot.slane %v1751_v13, 1  ;;  %v1758_v39 = vmax.f32 %v1756_v60, %v1757_v14  ;;  %v1855_v41 = vrot.slane %v1854_v59, 4  ;;  %v1861_v43 = vsel %vm1732_vm4, %v1818_v19, -inf }
 0x18e   : > { %v1746_v40 = vmax.f32 %v1744_v3, %v1745_v37  ;;  %v1862_v50 = vrot.slane %v1861_v43, 4  ;;  %v1868_v53 = vsel %vm1732_vm4, %v1817_v5, -inf  ;;  %v1638_v8 = vadd.f32 %v5031_v0, %v5051_v33  ;;  %v5080_v56 = vpop.f32.mrb[14].mxu0 }
 0x18f   : > { %v5082_v35 = vmax.f32 %v1779_v54, %v1780_v12  ;;  %v1759_v1 = vrot.slane %v1758_v39, 1  ;;  %v1856_v52 = vmax.f32 %v1854_v59, %v1855_v41  ;;  %v1869_v55 = vrot.slane %v1868_v53, 4  ;;  %v5084_v10 = vpop.f32.mrb[15].mxu0 }
 0x190   : > { %v1753_v57 = vmax.f32 %v1751_v13, %v1752_v38  ;;  %v1863_v58 = vmax.f32 %v1861_v43, %v1862_v50  ;;  %v1666_v60 = vmax.f32 %v1638_v8, 0.0  ;;  %v4270_v2 = vadd.f32 %v5057_v7, %v4982_v16 }
 0x191   : > { %v5088_v3 = vmax.f32 %v1758_v39, %v1759_v1  ;;  %v2348_v5 = vsel %vm2347_vm5, %v1746_v40, %v1739_v36  ;;  %v1857_v33 = vrot.slane %v1856_v52, 2  ;;  %v1870_v14 = vmax.f32 %v1868_v53, %v1869_v55 }
 0x192   : > { %v1864_v19 = vrot.slane %v1863_v58, 2  ;;  %v1782_v54 = vmax.f32 %v1664_v61, %v1666_v60  ;;  %v1641_v12 = vadd.f32 %v4270_v2, %v5031_v0  ;;  %v4271_v37 = vadd.f32 %v5061_v15, %v4984_v17  ;;  %v5094_v59 = vpop.f32.mrb[16].mxu0 }
 0x193   : > { %v1858_v13 = vmax.f32 %v1856_v52, %v1857_v33  ;;  %v1871_v38 = vrot.slane %v1870_v14, 2  ;;  %v4272_v41 = vadd.f32 %v4177_v62, %v4986_v18  ;;  %v4273_v16 = vadd.f32 %v1500_v27, %v4988_v20  ;;  %v5098_v7 = vpop.f32.mrb[17].mxu0 }
 0x194   : > { %v5101_v36 = vsel %vm2349_vm6, %v1753_v57, %v2348_v5  ;;  %v5103_v39 = vmax.f32 %v1863_v58, %v1864_v19  ;;  %v1786_v61 = vcombine.high %v1782_v54, %v1782_v54  ;;  %v1793_v43 = vrot.slane %v1782_v54, %v5040_v21 }
 0x195   : > { %v1859_v40 = vrot.slane %v1858_v13, 1  ;;  %v1669_v17 = vmax.f32 %v1641_v12, 0.0  ;;  %v1640_v15 = vadd.f32 %v4271_v37, %v5031_v0  ;;  %v1643_v50 = vadd.f32 %v4272_v41, %v5031_v0 }
 0x196   : > { %v5108_v53 = vmax.f32 %v1870_v14, %v1871_v38  ;;  %v1800_v18 = vrot.slane %v1786_v61, %v5040_v21  ;;  %v1801_v20 = vcombine.high %v1793_v43, %v1793_v43  ;;  %v1826_v62 = vsel %vm1732_vm4, %v1793_v43, -inf  ;;  %v5112_v27 = vpop.f32.mrb[18].mxu0 }
 0x197   : > { %v1827_v1 = vrot.slane %v1826_v62, 4  ;;  %v1668_v52 = vmax.f32 %v1640_v15, 0.0  ;;  %v1671_v55 = vmax.f32 %v1643_v50, 0.0  ;;  %v5115_v57 = vpop.f32.mrb[19].mxu0  ;;  %v1642_v5 = vadd.f32 %v4273_v16, %v5031_v0 }
 0x198   : > { %v1802_v58 = vcombine.high %v1800_v18, %v1800_v18  ;;  %v1833_v60 = vsel %vm1732_vm4, %v1801_v20, -inf  ;;  %v1840_v2 = vsel %vm1732_vm4, %v1800_v18, -inf  ;;  %v4274_v38 = vadd.f32 %v5069_v11, %v4990_v22 }
 0x199   : > { %v1828_v33 = vmax.f32 %v1826_v62, %v1827_v1  ;;  %v1834_v14 = vrot.slane %v1833_v60, 4  ;;  %v1841_v19 = vrot.slane %v1840_v2, 4  ;;  %v1876_v54 = vmax.f32 %v1669_v17, %v1671_v55 }
 0x19a   : > { %v1847_v12 = vsel %vm1732_vm4, %v1802_v58, -inf  ;;  %v1670_v37 = vmax.f32 %v1642_v5, 0.0  ;;  %v5125_v41 = vadd.f32 %v5071_v23, %v4992_v24  ;;  %v5127_v61 = vpop.f32.mrb[20].mxu0  ;;  %v5131_v20 = vmax.f32 %v1858_v13, %v1859_v40 }
 0x19b   : > { %v1829_v43 = vrot.slane %v1828_v33, 2  ;;  %v1835_v15 = vmax.f32 %v1833_v60, %v1834_v14  ;;  %v1842_v50 = vmax.f32 %v1840_v2, %v1841_v19  ;;  %v1848_v16 = vrot.slane %v1847_v12, 4  ;;  %v5129_v18 = vpop.f32.mrb[21].mxu0 }
 0x19c   : > { %v1896_v17 = vcombine.high %v1876_v54, %v1876_v54  ;;  %v1903_v62 = vrot.slane %v1876_v54, %v5040_v21  ;;  %v1875_v1 = vmax.f32 %v1668_v52, %v1670_v37 }
 0x19d   : > { %v1830_v55 = vmax.f32 %v1828_v33, %v1829_v43  ;;  %v1836_v22 = vrot.slane %v1835_v15, 2  ;;  %v1843_v11 = vrot.slane %v1842_v50, 2  ;;  %v1849_v58 = vmax.f32 %v1847_v12, %v1848_v16 }
 0x19e   : > { %v1910_v24 = vrot.slane %v1896_v17, %v5040_v21  ;;  %v1911_v23 = vcombine.high %v1903_v62, %v1903_v62  ;;  %v1947_v5 = vsel %vm1732_vm4, %v1903_v62, -inf  ;;  %v1879_v60 = vcombine.high %v1875_v1, %v1875_v1  ;;  %v5136_v2 = vpop.f32.mrb[22].mxu0 }
 0x19f   : > { %v1831_v14 = vrot.slane %v1830_v55, 1  ;;  %v1837_v19 = vmax.f32 %v1835_v15, %v1836_v22  ;;  %v1844_v13 = vmax.f32 %v1842_v50, %v1843_v11  ;;  %v1850_v40 = vrot.slane %v1849_v58, 2  ;;  %v5138_v9 = vpop.f32.mrb[23].mxu0 }
 0x1a0   : > { %v1948_v54 = vrot.slane %v1947_v5, 4  ;;  %v1954_v52 = vsel %vm1732_vm4, %v1911_v23, -inf  ;;  %v1961_v33 = vsel %vm1732_vm4, %v1910_v24, -inf  ;;  %v1886_v12 = vrot.slane %v1875_v1, %v5040_v21 }
 0x1a1   : > { %v1838_v37 = vrot.slane %v1837_v19, 1  ;;  %v1845_v43 = vrot.slane %v1844_v13, 1  ;;  %v1851_v16 = vmax.f32 %v1849_v58, %v1850_v40  ;;  %v5144_v17 = vadd.f32 %v4274_v38, %v5031_v0 }
 0x1a2   : > { %v1949_v62 = vmax.f32 %v1947_v5, %v1948_v54  ;;  %v1955_v8 = vrot.slane %v1954_v52, 4  ;;  %v1962_v15 = vrot.slane %v1961_v33, 4  ;;  %v1893_v50 = vrot.slane %v1879_v60, %v5040_v21  ;;  %v5147_v22 = vpop.f32.mrb[24].mxu0 }
 0x1a3   : > { %v5149_v11 = vmax.f32 %v1830_v55, %v1831_v14  ;;  %v5151_v23 = vmax.f32 %v1837_v19, %v1838_v37  ;;  %v1852_v24 = vrot.slane %v1851_v16, 1  ;;  %v1894_v25 = vcombine.high %v1886_v12, %v1886_v12  ;;  %v5153_v1 = vpop.f32.mrb[25].mxu0 }
 0x1a4   : > { %v1950_v58 = vrot.slane %v1949_v62, 2  ;;  %v1956_v40 = vmax.f32 %v1954_v52, %v1955_v8  ;;  %v5155_v38 = vmax.f32 %v1961_v33, %v1962_v15  ;;  %v1895_v5 = vcombine.high %v1893_v50, %v1893_v50 }
 0x1a5   : > { %v5157_v54 = vmax.f32 %v1844_v13, %v1845_v43  ;;  %v1919_v60 = vsel %vm1732_vm4, %v1886_v12, -inf  ;;  %v1926_v4 = vsel %vm1732_vm4, %v1894_v25, -inf  ;;  %v1933_v55 = vsel %vm1732_vm4, %v1893_v50, -inf }
 0x1a6   : > { %5771 = vst [vmem:[#allocation5_spill] sm:$0xff] %v5155_v38  ;;  %v5162_v14 = vmax.f32 %v1851_v16, %v1852_v24  ;;  %v1951_v19 = vmax.f32 %v1949_v62, %v1950_v58  ;;  %v1957_v37 = vrot.slane %v1956_v40, 2  ;;  %v1920_v6 = vrot.slane %v1919_v60, 4  ;;  %v5164_v51 = vpop.f32.mrb[26].mxu0 }
 0x1a7   : > { %v1927_v52 = vrot.slane %v1926_v4, 4  ;;  %v1934_v33 = vrot.slane %v1933_v55, 4  ;;  %v1940_v13 = vsel %vm1732_vm4, %v1895_v5, -inf  ;;  %v5168_v12 = vpop.f32.mrb[27].mxu0  ;;  %v1673_v16 = vmax.f32 %v5144_v17, 0.0 }
 0x1a8   : > { %v1952_v25 = vrot.slane %v1951_v19, 1  ;;  %v1921_v43 = vmax.f32 %v1919_v60, %v1920_v6  ;;  %v1941_v15 = vrot.slane %v1940_v13, 4  ;;  %v1644_v24 = vadd.f32 %v5125_v41, %v5031_v0 }
 0x1a9   : > { %v5171_v62 = vmax.f32 %v1926_v4, %v1927_v52  ;;  %v1935_v50 = vmax.f32 %v1933_v55, %v1934_v33  ;;  %v4276_v58 = vadd.f32 %v5080_v56, %v4998_v28  ;;  %v5179_v5 = vmax.f32 %v1956_v40, %v1957_v37 }
 0x1aa   : > { %v5177_v8 = vmax.f32 %v1951_v19, %v1952_v25  ;;  %v1942_v38 = vmax.f32 %v1940_v13, %v1941_v15  ;;  %v4277_v6 = vadd.f32 %v5084_v10, %v5000_v29  ;;  %v1922_v60 = vrot.slane %v1921_v43, 2 }
 0x1ab   : > { %v1929_v17 = vrot.slane %v5171_v62, 2  ;;  %v1936_v4 = vrot.slane %v1935_v50, 2  ;;  %v1647_v55 = vadd.f32 %v4276_v58, %v5031_v0  ;;  %v1672_v33 = vmax.f32 %v1644_v24, 0.0 }
 0x1ac   : > { %v1943_v52 = vrot.slane %v1942_v38, 2  ;;  %v1646_v41 = vadd.f32 %v4277_v6, %v5031_v0  ;;  %v4278_v28 = vadd.f32 %v5094_v59, %v5002_v30  ;;  %v4279_v19 = vadd.f32 %v5098_v7, %v5004_v31 }
 0x1ad   : > { %v1937_v56 = vmax.f32 %v1935_v50, %v1936_v4  ;;  %v1675_v40 = vmax.f32 %v1647_v55, 0.0  ;;  %v4280_v29 = vadd.f32 %v5112_v27, %v5006_v32  ;;  %v2352_v25 = vsel %vm2351_vm7, %v5088_v3, %v5101_v36 }
 0x1ae   : > { %v5192_v10 = vmax.f32 %v1942_v38, %v1943_v52  ;;  %v1674_v37 = vmax.f32 %v1646_v41, 0.0  ;;  %v1649_v13 = vadd.f32 %v4278_v28, %v5031_v0  ;;  %v5198_v15 = vmax.f32 %v1921_v43, %v1922_v60 }
 0x1af   : > { %v1938_v30 = vrot.slane %v1937_v56, 1  ;;  %v1969_v59 = vmax.f32 %v1673_v16, %v1675_v40  ;;  %v1651_v50 = vadd.f32 %v4280_v29, %v5031_v0  ;;  %v5203_v32 = vadd.f32 %v4279_v19, %v5031_v0 }
 0x1b0   : > { %v1945_v31 = vrot.slane %v5192_v10, 1  ;;  %v1968_v7 = vmax.f32 %v1672_v33, %v1674_v37  ;;  %v2354_v27 = vsel %vm2353_vm8, %v5066_v63, %v2352_v25  ;;  %v1677_v36 = vmax.f32 %v1649_v13, 0.0 }
 0x1b1   : > { %v5207_v38 = vmax.f32 %v1937_v56, %v1938_v30  ;;  %v1989_v24 = vcombine.high %v1969_v59, %v1969_v59  ;;  %v1996_v3 = vrot.slane %v1969_v59, %v5040_v21  ;;  %v1679_v58 = vmax.f32 %v1651_v50, 0.0 }
 0x1b2   : > { %v1972_v43 = vcombine.high %v1968_v7, %v1968_v7  ;;  %v1979_v16 = vrot.slane %v1968_v7, %v5040_v21  ;;  %v2356_v6 = vsel %vm2355_vm9, %v5073_v26, %v2354_v27 }
 0x1b3   : > { %v2003_v60 = vrot.slane %v1989_v24, %v5040_v21  ;;  %v2004_v4 = vcombine.high %v1996_v3, %v1996_v3  ;;  %v2040_v55 = vsel %vm1732_vm4, %v1996_v3, -inf  ;;  %v2358_v63 = vsel %vm2357_vm10, %v5082_v35, %v2356_v6 }
 0x1b4   : > { %v2041_v52 = vrot.slane %v2040_v55, 4  ;;  %v1986_v33 = vrot.slane %v1972_v43, %v5040_v21  ;;  %v1987_v41 = vcombine.high %v1979_v16, %v1979_v16  ;;  %v2012_v28 = vsel %vm1732_vm4, %v1979_v16, -inf }
 0x1b5   : > { %v2047_v56 = vsel %vm1732_vm4, %v2004_v4, -inf  ;;  %v2054_v40 = vsel %vm1732_vm4, %v2003_v60, -inf  ;;  %v2013_v19 = vrot.slane %v2012_v28, 4  ;;  %v2062_v26 = vmax.f32 %v1677_v36, %v1679_v58 }
 0x1b6   : > { %v2042_v29 = vmax.f32 %v2040_v55, %v2041_v52  ;;  %v2048_v37 = vrot.slane %v2047_v56, 4  ;;  %v2055_v13 = vrot.slane %v2054_v40, 4  ;;  %v1988_v25 = vcombine.high %v1986_v33, %v1986_v33 }
 0x1b7   : > { %v2014_v30 = vmax.f32 %v2012_v28, %v2013_v19  ;;  %v2019_v35 = vsel %vm1732_vm4, %v1987_v41, -inf  ;;  %v2026_v59 = vsel %vm1732_vm4, %v1986_v33, -inf  ;;  %v2082_v50 = vcombine.high %v2062_v26, %v2062_v26 }
 0x1b8   : > { %v2043_v7 = vrot.slane %v2042_v29, 2  ;;  %v2049_v27 = vmax.f32 %v2047_v56, %v2048_v37  ;;  %v5223_v24 = vmax.f32 %v2054_v40, %v2055_v13  ;;  %v2020_v3 = vrot.slane %v2019_v35, 4 }
 0x1b9   : > { %v2015_v43 = vrot.slane %v2014_v30, 2  ;;  %v2027_v16 = vrot.slane %v2026_v59, 4  ;;  %v2033_v36 = vsel %vm1732_vm4, %v1988_v25, -inf  ;;  %v2089_v58 = vrot.slane %v2062_v26, %v5040_v21 }
 0x1ba   : > { %v2044_v6 = vmax.f32 %v2042_v29, %v2043_v7  ;;  %v2050_v60 = vrot.slane %v2049_v27, 2  ;;  %v2021_v4 = vmax.f32 %v2019_v35, %v2020_v3  ;;  %v1676_v55 = vmax.f32 %v5203_v32, 0.0 }
 0x1bb   : > { %v5228_v52 = vmax.f32 %v2014_v30, %v2015_v43  ;;  %v5230_v33 = vmax.f32 %v2026_v59, %v2027_v16  ;;  %v2034_v41 = vrot.slane %v2033_v36, 4  ;;  %v2096_v28 = vrot.slane %v2082_v50, %v5040_v21 }
 0x1bc   : > { %v2045_v56 = vrot.slane %v2044_v6, 1  ;;  %v5233_v40 = vmax.f32 %v2049_v27, %v2050_v60  ;;  %v2057_v19 = vrot.slane %v5223_v24, 2  ;;  %v2097_v37 = vcombine.high %v2089_v58, %v2089_v58 }
 0x1bd   : > { %v2017_v26 = vrot.slane %v5228_v52, 1  ;;  %v2022_v29 = vrot.slane %v2021_v4, 2  ;;  %v2035_v13 = vmax.f32 %v2033_v36, %v2034_v41  ;;  %v2133_v25 = vsel %vm1732_vm4, %v2089_v58, -inf }
 0x1be   : > { %v5238_v32 = vmax.f32 %v2044_v6, %v2045_v56  ;;  %v2029_v30 = vrot.slane %v5230_v33, 2  ;;  %v2134_v35 = vrot.slane %v2133_v25, 4  ;;  %v2140_v59 = vsel %vm1732_vm4, %v2097_v37, -inf }
 0x1bf   : > { %v2036_v50 = vrot.slane %v2035_v13, 2  ;;  %v2141_v7 = vrot.slane %v2140_v59, 4  ;;  %v2147_v27 = vsel %vm1732_vm4, %v2096_v28, -inf  ;;  %v2444_v3 = vsel %vm503_vm1, %v2358_v63, %v5149_v11 }
 0x1c0   : > { %v2135_v43 = vmax.f32 %v2133_v25, %v2134_v35  ;;  %v2148_v16 = vrot.slane %v2147_v27, 4  ;;  %4208 = vmatmul.mubr.msk.f32.vlgmr.msra.gmra.mrb[22].mxu1 %vm2462_vm11, %v2444_v3  ;;  %v4281_v36 = vadd.f32 %v5115_v57, %v5010_v34  ;;  %v4282_v58 = vadd.f32 %v5127_v61, %v5012_v42 }
 0x1c1   : > { %v5250_v6 = vmax.f32 %v2021_v4, %v2022_v29  ;;  %v2142_v60 = vmax.f32 %v2140_v59, %v2141_v7  ;;  %v4283_v41 = vadd.f32 %v5129_v18, %v5014_v44  ;;  %v4284_v28 = vadd.f32 %v5136_v2, %v5016_v45 }
 0x1c2   : > { %v5772_v11 = vmov 0.0   ;;  %v2136_v63 = vrot.slane %v2135_v43, 2  ;;  %v5258_v56 = vmax.f32 %v2147_v27, %v2148_v16  ;;  %v1650_v34 = vadd.f32 %v4281_v36, %v5031_v0 }
 0x1c3   : > { %4210 = vmatprep.mubr.msk.f32.mxu1 %vm4447_vm3, %v5772_v11  ;;  %v1653_v57 = vadd.f32 %v4282_v58, %v5031_v0  ;;  %v2143_v42 = vrot.slane %v2142_v60, 2  ;;  %v1652_v61 = vadd.f32 %v4283_v41, %v5031_v0  ;;  %v1655_v4 = vadd.f32 %v4284_v28, %v5031_v0 }
 0x1c4   : > { %v4285_v44 = vadd.f32 %v5138_v9, %v5018_v46  ;;  %v5266_v18 = vmax.f32 %v2035_v13, %v2036_v50  ;;  %v5268_v45 = vmax.f32 %v2135_v43, %v2136_v63  ;;  %v2150_v2 = vrot.slane %v5258_v56, 2 }
 0x1c5   : > { %v1678_v37 = vmax.f32 %v1650_v34, 0.0  ;;  %v5271_v29 = vmax.f32 %v2142_v60, %v2143_v42  ;;  %v1681_v25 = vmax.f32 %v1653_v57, 0.0  ;;  %v1683_v35 = vmax.f32 %v1655_v4, 0.0 }
 0x1c6   : > { %v1654_v59 = vadd.f32 %v4285_v44, %v5031_v0  ;;  %v1680_v27 = vmax.f32 %v1652_v61, 0.0  ;;  %v4286_v3 = vadd.f32 %v5147_v22, %v5020_v47  ;;  %v4287_v9 = vadd.f32 %v5153_v1, %v5022_v48 }
 0x1c7   : > { %v2061_v7 = vmax.f32 %v1676_v55, %v1678_v37  ;;  %v2155_v13 = vmax.f32 %v1681_v25, %v1683_v35  ;;  %v1873_v43 = vrot.slane %v5108_v53, 1  ;;  %v5773_v55 = vrot.slane %v5103_v39, 1 }
 0x1c8   : > { %v1682_v50 = vmax.f32 %v1654_v59, 0.0  ;;  %v5282_v58 = vadd.f32 %v4286_v3, %v5031_v0  ;;  %v5291_v1 = vadd.f32 %v4287_v9, %v5031_v0 }
 0x1c9   : > { %v2065_v16 = vcombine.high %v2061_v7, %v2061_v7  ;;  %v2072_v36 = vrot.slane %v2061_v7, %v5040_v21  ;;  %v5287_v60 = vmax.f32 %v5103_v39, %v5773_v55  ;;  %v2175_v47 = vcombine.high %v2155_v13, %v2155_v13 }
 0x1ca   : > { %v2182_v48 = vrot.slane %v2155_v13, %v5040_v21  ;;  %v2154_v22 = vmax.f32 %v1680_v27, %v1682_v50  ;;  %v5296_v34 = vmax.f32 %v5108_v53, %v1873_v43 }
 0x1cb   : > { %v2079_v41 = vrot.slane %v2065_v16, %v5040_v21  ;;  %v2080_v28 = vcombine.high %v2072_v36, %v2072_v36  ;;  %v2105_v63 = vsel %vm1732_vm4, %v2072_v36, -inf  ;;  %v2189_v42 = vrot.slane %v2175_v47, %v5040_v21 }
 0x1cc   : > { %v2106_v57 = vrot.slane %v2105_v63, 4  ;;  %v2190_v39 = vcombine.high %v2182_v48, %v2182_v48  ;;  %v2226_v61 = vsel %vm1732_vm4, %v2182_v48, -inf }
 0x1cd   : > { %v2081_v4 = vcombine.high %v2079_v41, %v2079_v41  ;;  %v2112_v44 = vsel %vm1732_vm4, %v2080_v28, -inf  ;;  %v2119_v37 = vsel %vm1732_vm4, %v2079_v41, -inf  ;;  %v2227_v25 = vrot.slane %v2226_v61, 4 }
 0x1ce   : > { %v2107_v35 = vmax.f32 %v2105_v63, %v2106_v57  ;;  %v2113_v59 = vrot.slane %v2112_v44, 4  ;;  %v2120_v7 = vrot.slane %v2119_v37, 4  ;;  %v2233_v27 = vsel %vm1732_vm4, %v2190_v39, -inf }
 0x1cf   : > { %v2126_v53 = vsel %vm1732_vm4, %v2081_v4, -inf  ;;  %v2228_v3 = vmax.f32 %v2226_v61, %v2227_v25  ;;  %v2234_v9 = vrot.slane %v2233_v27, 4  ;;  %v2240_v13 = vsel %vm1732_vm4, %v2189_v42, -inf }
 0x1d0   : > { %v2108_v50 = vrot.slane %v2107_v35, 2  ;;  %v2114_v43 = vmax.f32 %v2112_v44, %v2113_v59  ;;  %v2121_v16 = vmax.f32 %v2119_v37, %v2120_v7  ;;  %v2127_v36 = vrot.slane %v2126_v53, 4 }
 0x1d1   : > { %v2229_v55 = vrot.slane %v2228_v3, 2  ;;  %v5305_v47 = vmax.f32 %v2233_v27, %v2234_v9  ;;  %v2241_v48 = vrot.slane %v2240_v13, 4  ;;  %v2158_v41 = vcombine.high %v2154_v22, %v2154_v22 }
 0x1d2   : > { %v2109_v28 = vmax.f32 %v2107_v35, %v2108_v50  ;;  %v2115_v63 = vrot.slane %v2114_v43, 2  ;;  %v2122_v57 = vrot.slane %v2121_v16, 2  ;;  %v1685_v39 = vmax.f32 %v5282_v58, 0.0 }
 0x1d3   : > { %v5308_v4 = vmax.f32 %v2126_v53, %v2127_v36  ;;  %v5310_v61 = vmax.f32 %v2228_v3, %v2229_v55  ;;  %v5312_v42 = vmax.f32 %v2240_v13, %v2241_v48  ;;  %v2165_v44 = vrot.slane %v2154_v22, %v5040_v21 }
 0x1d4   : > { %v2110_v37 = vrot.slane %v2109_v28, 1  ;;  %v5315_v25 = vmax.f32 %v2114_v43, %v2115_v63  ;;  %v2172_v35 = vrot.slane %v2158_v41, %v5040_v21  ;;  %v5319_v7 = vmax.f32 %v2121_v16, %v2122_v57 }
 0x1d5   : > { %v2173_v53 = vcombine.high %v2165_v44, %v2165_v44  ;;  %v2198_v3 = vsel %vm1732_vm4, %v2165_v44, -inf  ;;  %v1684_v22 = vmax.f32 %v5291_v1, 0.0  ;;  %v1924_v55 = vrot.slane %v5198_v15, 1 }
 0x1d6   : > { %v5323_v9 = vmax.f32 %v2109_v28, %v2110_v37  ;;  %v2174_v13 = vcombine.high %v2172_v35, %v2172_v35  ;;  %v2199_v50 = vrot.slane %v2198_v3, 4  ;;  %v2212_v36 = vsel %vm1732_vm4, %v2172_v35, -inf }
 0x1d7   : > { %v2205_v43 = vsel %vm1732_vm4, %v2173_v53, -inf  ;;  %v1930_v16 = vmax.f32 %v5171_v62, %v1929_v17  ;;  %v2213_v63 = vrot.slane %v2212_v36, 4  ;;  %v1925_v44 = vmax.f32 %v5198_v15, %v1924_v55 }
 0x1d8   : > { %v2200_v48 = vmax.f32 %v2198_v3, %v2199_v50  ;;  %v2206_v41 = vrot.slane %v2205_v43, 4  ;;  %v2219_v28 = vsel %vm1732_vm4, %v2174_v13, -inf  ;;  %v2367_v53 = vsel %vm2347_vm5, %v5157_v54, %v5151_v23 }
 0x1d9   : > { %v2220_v57 = vrot.slane %v2219_v28, 4  ;;  %v1931_v37 = vrot.slane %v1930_v16, 1  ;;  %v2214_v59 = vmax.f32 %v2212_v36, %v2213_v63  ;;  %v2368_v46 = vsel %vm2349_vm6, %v5162_v14, %v2367_v53 }
 0x1da   : > { %v2201_v35 = vrot.slane %v2200_v48, 2  ;;  %v2207_v27 = vmax.f32 %v2205_v43, %v2206_v41  ;;  %v2369_v3 = vsel %vm2351_vm7, %v5131_v20, %v2368_v46  ;;  %v4288_v15 = vadd.f32 %v5164_v51, %v5024_v49 }
 0x1db   : > { %v5339_v62 = vmax.f32 %v2219_v28, %v2220_v57  ;;  %v1932_v17 = vmax.f32 %v1930_v16, %v1931_v37  ;;  %v2215_v55 = vrot.slane %v2214_v59, 2  ;;  %v2370_v23 = vsel %vm2353_vm8, %v5287_v60, %v2369_v3  ;;  %v5775_v28 = vld [vmem:[#allocation5_spill] sm:$0xff] }
 0x1dc   : > { %v2202_v13 = vmax.f32 %v2200_v48, %v2201_v35  ;;  %v2208_v50 = vrot.slane %v2207_v27, 2  ;;  %v2117_v54 = vrot.slane %v5315_v25, 1  ;;  %v2371_v14 = vsel %vm2355_vm9, %v5296_v34, %v2370_v23  ;;  %v5774_v48 = vld [vmem:[#allocation3_spill] sm:$0xff] }
 0x1dd   : > { %v2382_v43 = vsel %vm2381_vm12, %v1932_v17, %v1925_v44  ;;  %v1659_v36 = vadd.f32 %v4288_v15, %v5031_v0  ;;  %v5352_v46 = vmax.f32 %v2214_v59, %v2215_v55  ;;  %v4289_v60 = vadd.f32 %v5168_v12, %v5774_v48 }
 0x1de   : > { %v2203_v16 = vrot.slane %v2202_v13, 1  ;;  %v2209_v20 = vmax.f32 %v2207_v27, %v2208_v50  ;;  %v2446_v49 = vsel %vm2445_vm13, %v2371_v14, %v2382_v43  ;;  %v1946_v34 = vmax.f32 %v5192_v10, %v1945_v31 }
 0x1df   : > { %4211 = vmatmul.mubr.msk.f32.gmra.mrb[24].mxu1 %vm2462_vm11, %v2446_v49  ;;  %v1687_v51 = vmax.f32 %v1659_v36, 0.0  ;;  %v1959_v41 = vrot.slane %v5179_v5, 1  ;;  %v2222_v59 = vrot.slane %v5339_v62, 2  ;;  %v5776_v57 = vrot.slane %v5775_v28, 2 }
 0x1e0   : > { %v5362_v63 = vmax.f32 %v2202_v13, %v2203_v16  ;;  %v2210_v27 = vrot.slane %v2209_v20, 1  ;;  %4213 = vmatprep.mubr.msk.f32.mxu1 %vm4447_vm3, %v5772_v11  ;;  %v2217_v12 = vrot.slane %v5352_v46, 1  ;;  %v1658_v31 = vadd.f32 %v4289_v60, %v5031_v0 }
 0x1e1   : > { %v1965_v44 = vmax.f32 %v5775_v28, %v5776_v57  ;;  %v2248_v10 = vmax.f32 %v1685_v39, %v1687_v51  ;;  %v1960_v37 = vmax.f32 %v5179_v5, %v1959_v41  ;;  %v2018_v35 = vmax.f32 %v5228_v52, %v2017_v26 }
 0x1e2   : > { %v2024_v17 = vrot.slane %v5250_v6, 1  ;;  %v2030_v3 = vmax.f32 %v5230_v33, %v2029_v30  ;;  %v1686_v58 = vmax.f32 %v1658_v31, 0.0  ;;  %v2383_v0 = vsel %vm2347_vm5, %v1946_v34, %v5207_v38 }
 0x1e3   : > { %v1966_v53 = vrot.slane %v1965_v44, 1  ;;  %v2268_v15 = vcombine.high %v2248_v10, %v2248_v10  ;;  %v2275_v13 = vrot.slane %v2248_v10, %v5040_v21  ;;  %v2384_v52 = vsel %vm2349_vm6, %v5177_v8, %v2383_v0 }
 0x1e4   : > { %v2025_v5 = vmax.f32 %v5250_v6, %v2024_v17  ;;  %v2031_v50 = vrot.slane %v2030_v3, 1  ;;  %v2247_v33 = vmax.f32 %v1684_v22, %v1686_v58  ;;  %v2385_v43 = vsel %vm2351_vm7, %v1960_v37, %v2384_v52 }
 0x1e5   : > { %v1967_v39 = vmax.f32 %v1965_v44, %v1966_v53  ;;  %v2282_v26 = vrot.slane %v2268_v15, %v5040_v21  ;;  %v2283_v55 = vcombine.high %v2275_v13, %v2275_v13  ;;  %v2319_v23 = vsel %vm1732_vm4, %v2275_v13, -inf }
 0x1e6   : > { %v2320_v30 = vrot.slane %v2319_v23, 4  ;;  %v2032_v14 = vmax.f32 %v2030_v3, %v2031_v50  ;;  %v2396_v38 = vsel %vm2357_vm10, %v2025_v5, %v2018_v35  ;;  %v5394_v36 = vmax.f32 %v2209_v20, %v2210_v27 }
 0x1e7   : > { %v2326_v6 = vsel %vm1732_vm4, %v2283_v55, -inf  ;;  %v2251_v16 = vcombine.high %v2247_v33, %v2247_v33  ;;  %v2258_v8 = vrot.slane %v2247_v33, %v5040_v21  ;;  %v5399_v48 = vsel %vm1732_vm4, %v2282_v26, -inf }
 0x1e8   : > { %v2321_v49 = vmax.f32 %v2319_v23, %v2320_v30  ;;  %v2327_v51 = vrot.slane %v2326_v6, 4  ;;  %v2386_v1 = vsel %vm2353_vm8, %v1967_v39, %v2385_v43  ;;  %v2397_v20 = vsel %vm2381_vm12, %v2032_v14, %v2396_v38 }
 0x1e9   : > { %v2265_v22 = vrot.slane %v2251_v16, %v5040_v21  ;;  %v2266_v60 = vcombine.high %v2258_v8, %v2258_v8  ;;  %v2291_v34 = vsel %vm1732_vm4, %v2258_v8, -inf  ;;  %v2448_v57 = vsel %vm2447_vm14, %v2386_v1, %v2397_v20 }
 0x1ea   : > { %v2322_v41 = vrot.slane %v2321_v49, 2  ;;  %v5405_v27 = vmax.f32 %v2326_v6, %v2327_v51  ;;  %v2292_v28 = vrot.slane %v2291_v34, 4  ;;  %4214 = vmatmul.mubr.msk.f32.gmra.mrb[26].mxu1 %vm2462_vm11, %v2448_v57  ;;  %v2038_v37 = vrot.slane %v5266_v18, 1 }
 0x1eb   : > { %v2267_v44 = vcombine.high %v2265_v22, %v2265_v22  ;;  %v2298_v10 = vsel %vm1732_vm4, %v2266_v60, -inf  ;;  %v2305_v31 = vsel %vm1732_vm4, %v2265_v22, -inf  ;;  %v2334_v35 = vrot.slane %v5399_v48, 4  ;;  %4216 = vmatprep.mubr.msk.f32.mxu1 %vm4447_vm3, %v5772_v11 }
 0x1ec   : > { %v5412_v53 = vmax.f32 %v2321_v49, %v2322_v41  ;;  %v2293_v17 = vmax.f32 %v2291_v34, %v2292_v28  ;;  %v2299_v3 = vrot.slane %v2298_v10, 4  ;;  %v2306_v15 = vrot.slane %v2305_v31, 4 }
 0x1ed   : > { %v2312_v13 = vsel %vm1732_vm4, %v2267_v44, -inf  ;;  %v2039_v58 = vmax.f32 %v5266_v18, %v2038_v37  ;;  %v2052_v0 = vrot.slane %v5233_v40, 1  ;;  %v2329_v39 = vrot.slane %v5405_v27, 2 }
 0x1ee   : > { %v2294_v5 = vrot.slane %v2293_v17, 2  ;;  %v2300_v50 = vmax.f32 %v2298_v10, %v2299_v3  ;;  %v2313_v52 = vrot.slane %v2312_v13, 4  ;;  %v2307_v26 = vmax.f32 %v2305_v31, %v2306_v15 }
 0x1ef   : > { %v2053_v55 = vmax.f32 %v5233_v40, %v2052_v0  ;;  %v2058_v23 = vmax.f32 %v5223_v24, %v2057_v19  ;;  %v2118_v33 = vmax.f32 %v5315_v25, %v2117_v54  ;;  %v2124_v43 = vrot.slane %v5319_v7, 1 }
 0x1f0   : > { %v2295_v30 = vmax.f32 %v2293_v17, %v2294_v5  ;;  %v2301_v18 = vrot.slane %v2300_v50, 2  ;;  %v2314_v14 = vmax.f32 %v2312_v13, %v2313_v52  ;;  %v2308_v38 = vrot.slane %v2307_v26, 2 }
 0x1f1   : > { %v2059_v6 = vrot.slane %v2058_v23, 1  ;;  %v2129_v16 = vrot.slane %v5308_v4, 2  ;;  %v2398_v40 = vsel %vm2347_vm5, %v5238_v32, %v2039_v58  ;;  %v2125_v24 = vmax.f32 %v5319_v7, %v2124_v43 }
 0x1f2   : > { %v2296_v8 = vrot.slane %v2295_v30, 1  ;;  %v2302_v49 = vmax.f32 %v2300_v50, %v2301_v18  ;;  %v2315_v51 = vrot.slane %v2314_v14, 2  ;;  %v2309_v19 = vmax.f32 %v2307_v26, %v2308_v38 }
 0x1f3   : > { %v2060_v1 = vmax.f32 %v2058_v23, %v2059_v6  ;;  %v2130_v25 = vmax.f32 %v5308_v4, %v2129_v16  ;;  %v2399_v54 = vsel %vm2349_vm6, %v2053_v55, %v2398_v40  ;;  %v2324_v22 = vrot.slane %v5412_v53, 1 }
 0x1f4   : > { %v2297_v60 = vmax.f32 %v2295_v30, %v2296_v8  ;;  %v2303_v34 = vrot.slane %v2302_v49, 1  ;;  %v2410_v20 = vsel %vm2355_vm9, %v2118_v33, %v5323_v9  ;;  %v2310_v32 = vrot.slane %v2309_v19, 1 }
 0x1f5   : > { %v2316_v41 = vmax.f32 %v2314_v14, %v2315_v51  ;;  %v2131_v28 = vrot.slane %v2130_v25, 1  ;;  %v2400_v57 = vsel %vm2351_vm7, %v2060_v1, %v2399_v54  ;;  %v2411_v44 = vsel %vm2357_vm10, %v2125_v24, %v2410_v20  ;;  %v3785_v54 = vld [vmem:[%s5751_s5 + $0x18] sm:$0xff] }
 0x1f6   : > { %v2304_v7 = vmax.f32 %v2302_v49, %v2303_v34  ;;  %v2145_v4 = vrot.slane %v5271_v29, 1  ;;  %v2151_v10 = vmax.f32 %v5258_v56, %v2150_v2  ;;  %v5777_v37 = vrot.slane %v5268_v45, 1 }
 0x1f7   : > { %v2132_v31 = vmax.f32 %v2130_v25, %v2131_v28  ;;  %v2218_v17 = vmax.f32 %v5352_v46, %v2217_v12  ;;  %v2223_v3 = vmax.f32 %v5339_v62, %v2222_v59  ;;  %v2231_v58 = vrot.slane %v5310_v61, 1  ;;  %v3784_v25 = vld [vmem:[%s5751_s5 + $0x10] sm:$0xff] }
 0x1f8   : > { %v2139_v9 = vmax.f32 %v5268_v45, %v5777_v37  ;;  %v2146_v15 = vmax.f32 %v5271_v29, %v2145_v4  ;;  %v2152_v13 = vrot.slane %v2151_v10, 1  ;;  %v2424_v56 = vsel %vm2353_vm8, %v5394_v36, %v5362_v63 }
 0x1f9   : > { %v2311_v2 = vmax.f32 %v2309_v19, %v2310_v32  ;;  %v2412_v45 = vsel %vm2381_vm12, %v2132_v31, %v2411_v44  ;;  %v2224_v0 = vrot.slane %v2223_v3, 1  ;;  %v5778_v5 = vrot.slane %v5305_v47, 2  ;;  %v3776_v32 = vld [vmem:[%s5750_s4] ss:$0 sm:$0xff] }
 0x1fa   : > { %v2449_v12 = vsel %vm624_vm0, %v2400_v57, %v2412_v45  ;;  %v2153_v62 = vmax.f32 %v2151_v10, %v2152_v13  ;;  %v2413_v29 = vsel %vm2347_vm5, %v2146_v15, %v2139_v9  ;;  %v2425_v59 = vsel %vm2355_vm9, %v2218_v17, %v2424_v56 }
 0x1fb   : > { %v2237_v46 = vmax.f32 %v5305_v47, %v5778_v5  ;;  %4217 = vmatmul.mubr.msk.f32.gmra.mrb[28].mxu1 %vm2462_vm11, %v2449_v12  ;;  %v2225_v50 = vmax.f32 %v2223_v3, %v2224_v0  ;;  %v5779_v63 = vrot.slane %v5312_v42, 2  ;;  %v2317_v26 = vrot.slane %v2316_v41, 1 }
 0x1fc   : > { %4219 = vmatprep.mubr.msk.f32.mxu1 %vm4447_vm3, %v5772_v11  ;;  %v2232_v47 = vmax.f32 %v5310_v61, %v2231_v58  ;;  %v2414_v55 = vsel %vm2349_vm6, %v2153_v62, %v2413_v29  ;;  %v2330_v23 = vmax.f32 %v5405_v27, %v2329_v39  ;;  %v2438_v33 = vsel %vm2351_vm7, %v2304_v7, %v2297_v60 }
 0x1fd   : > { %v2238_v52 = vrot.slane %v2237_v46, 1  ;;  %v2244_v36 = vmax.f32 %v5312_v42, %v5779_v63  ;;  %v2426_v30 = vsel %vm2357_vm10, %v2225_v50, %v2425_v59  ;;  %v2318_v14 = vmax.f32 %v2316_v41, %v2317_v26 }
 0x1fe   : > { %v2325_v43 = vmax.f32 %v5412_v53, %v2324_v22  ;;  %v2427_v42 = vsel %vm2381_vm12, %v2232_v47, %v2426_v30  ;;  %v2331_v6 = vrot.slane %v2330_v23, 1  ;;  %v2439_v16 = vsel %vm2353_vm8, %v2311_v2, %v2438_v33 }
 0x1ff   : > { %v2245_v18 = vrot.slane %v2244_v36, 1  ;;  %v2239_v38 = vmax.f32 %v2237_v46, %v2238_v52  ;;  %v2451_v61 = vsel %vm2450_vm15, %v2414_v55, %v2427_v42  ;;  %v2440_v8 = vsel %vm2355_vm9, %v2318_v14, %v2439_v16 }
 0x200   : > { %v2335_v27 = vmax.f32 %v5399_v48, %v2334_v35  ;;  %4220 = vmatmul.mubr.msk.f32.gmra.mrb[30].mxu1 %vm2462_vm11, %v2451_v61  ;;  %v2332_v39 = vmax.f32 %v2330_v23, %v2331_v6  ;;  %v2441_v53 = vsel %vm2357_vm10, %v2325_v43, %v2440_v8  ;;  %vm2452_vm4 = vcmask 1041408  }
 0x201   : > { %v2246_v40 = vmax.f32 %v2244_v36, %v2245_v18  ;;  %4222 = vmatprep.mubr.msk.f32.mxu1 %vm4447_vm3, %v5772_v11  ;;  %v4449_v22 = vmov 0.0|0.0   ;;  %v4257_v60 = vpack.c.bf16 %v3785_v54, %v3784_v25  ;;  %vm2590_vm7 = vcmask 1040384  }
 0x202   : > { %v2336_v49 = vrot.slane %v2335_v27, 2  ;;  %v2442_v24 = vsel %vm2381_vm12, %v2332_v39, %v2441_v53  ;;  %4256 = vmatprep.subr.bf16.mxu1 %v4449_v22  ;;  %vm2616_vm10 = vcmask 123904  }
 0x203   : > { %v2428_v51 = vsel %vm2347_vm5, %v2246_v40, %v2239_v38  ;;  %4258 = vmatpush3.bf16.msra.mxu1 %v4257_v60 }
 0x204   : > { %v2453_v19 = vsel %vm2452_vm4, %v2428_v51, %v2442_v24  ;;  %v2337_v1 = vmax.f32 %v2335_v27, %v2336_v49  ;;  %4259 = vmatprep.subr.bf16.mxu1 %v4449_v22 }
 0x205   : > { %4223 = vmatmul.mubr.msk.f32.gmra.mrb[32].mxu1 %vm2462_vm11, %v2453_v19 }
 0x206   : > { %4225 = vmatprep.mubr.msk.f32.mxu1 %vm4447_vm3, %v5772_v11  ;;  %v2338_v48 = vrot.slane %v2337_v1, 1 }
 0x208   : > { %v2339_v35 = vmax.f32 %v2337_v1, %v2338_v48 }
 0x20a   : > { %4226 = vmatmul.mubr.msk.f32.gmra.mrb[34].mxu1 %vm2462_vm11, %v2339_v35 }
 0x20b   : > { %4232 = vmatprep.mubr.msk.f32.mxu1 %vm4447_vm3, %v5772_v11 }
 0x293   : > { %v2549_v34 = vpop.f32.mrb[22].mxu1 }
 0x294   : > { %v4209_v20 = vpop.f32.mrb[23].mxu1  ;;  %v2550_v41 = vadd.f32 %v3776_v32, %v2549_v34 }
 0x296   : > { %v2582_v57 = vmax.f32 %v2550_v41, 0.0 }
 0x298   : > { %v2591_v10 = vrot.slane %v2582_v57, 7 }
 0x2b2   : > { %v2554_v28 = vpop.f32.mrb[24].mxu1 }
 0x2b3   : > { %v2555_v7 = vadd.f32 %v3776_v32, %v2554_v28  ;;  %v4212_v44 = vpop.f32.mrb[25].mxu1 }
 0x2b5   : > { %v2583_v4 = vmax.f32 %v2555_v7, 0.0 }
 0x2b7   : > { %v2592_v31 = vrot.slane %v2583_v4, 7 }
 0x2b9   : > { %v2593_v37 = vsel %vm2590_vm7, %v2591_v10, %v2592_v31 }
 0x2ba   : > { %v2595_v9 = vmax.f32 %v2582_v57, %v2593_v37 }
 0x2bc   : > { %v2604_v58 = vrot.slane %v2595_v9, %v5040_v21  ;;  %v2597_v2 = vcombine.high %v2595_v9, %v2595_v9 }
 0x2bd   : > { %v2559_v17 = vpop.f32.mrb[26].mxu1 }
 0x2be   : > { %v2560_v3 = vadd.f32 %v3776_v32, %v2559_v17  ;;  %v4215_v15 = vpop.f32.mrb[27].mxu1  ;;  %v2612_v0 = vcombine.high %v2604_v58, %v2604_v58  ;;  %v2611_v46 = vrot.slane %v2597_v2, %v5040_v21  ;;  %v2617_v59 = vsel %vm2616_vm10, %v2604_v58, -inf }
 0x2bf   : > { %v2618_v26 = vrot.slane %v2617_v59, 4 }
 0x2c0   : > { %v2584_v13 = vmax.f32 %v2560_v3, 0.0  ;;  %v2624_v62 = vsel %vm2616_vm10, %v2612_v0, -inf  ;;  %v2631_v50 = vsel %vm2616_vm10, %v2611_v46, -inf }
 0x2c1   : > { %v2625_v52 = vrot.slane %v2624_v62, 4  ;;  %v2632_v47 = vrot.slane %v2631_v50, 4  ;;  %v2619_v14 = vmax.f32 %v2617_v59, %v2618_v26 }
 0x2c2   : > { %v2640_v56 = vrot.slane %v2584_v13, 7 }
 0x2c3   : > { %v2626_v30 = vmax.f32 %v2624_v62, %v2625_v52  ;;  %v2633_v43 = vmax.f32 %v2631_v50, %v2632_v47  ;;  %v2620_v53 = vrot.slane %v2619_v14, 2 }
 0x2c4   : > { %v2645_v45 = vmax.f32 %v2583_v4, %v2640_v56 }
 0x2c5   : > { %v2627_v40 = vrot.slane %v2626_v30, 2  ;;  %v2634_v49 = vrot.slane %v2633_v43, 2  ;;  %v2621_v41 = vmax.f32 %v2619_v14, %v2620_v53 }
 0x2c6   : > { %v2649_v5 = vcombine.high %v2645_v45, %v2645_v45 }
 0x2c7   : > { %v2628_v25 = vmax.f32 %v2626_v30, %v2627_v40  ;;  %v2635_v28 = vmax.f32 %v2633_v43, %v2634_v49 }
 0x2c8   : > { %v2656_v12 = vrot.slane %v2649_v5, %v5040_v21 }
 0x2c9   : > { %v2636_v45 = vrot.slane %v2635_v28, 1 }
 0x2ca   : > { %v2657_v29 = vcombine.high %v2656_v12, %v2656_v12 }
 0x2cc   : > { %v2669_v63 = vsel %vm2616_vm10, %v2657_v29, -inf }
 0x2cd   : > { %v2670_v33 = vrot.slane %v2669_v63, 4 }
 0x2ce   : > { %v2564_v36 = vpop.f32.mrb[28].mxu1 }
 0x2cf   : > { %v2565_v55 = vadd.f32 %v3776_v32, %v2564_v36  ;;  %v4218_v23 = vpop.f32.mrb[29].mxu1  ;;  %v2671_v6 = vmax.f32 %v2669_v63, %v2670_v33 }
 0x2d0   : > { %v2637_v23 = vmax.f32 %v2635_v28, %v2636_v45 }
 0x2d1   : > { %v2585_v18 = vmax.f32 %v2565_v55, 0.0  ;;  %v2672_v24 = vrot.slane %v2671_v6, 2 }
 0x2d3   : > { %v2641_v42 = vrot.slane %v2585_v18, 7  ;;  %v2569_v38 = vpop.f32.mrb[30].mxu1  ;;  %v2673_v7 = vmax.f32 %v2671_v6, %v2672_v24 }
 0x2d4   : > { %v2570_v16 = vadd.f32 %v3776_v32, %v2569_v38  ;;  %v4221_v61 = vpop.f32.mrb[31].mxu1 }
 0x2d5   : > { %v2642_v8 = vsel %vm2590_vm7, %v2640_v56, %v2641_v42  ;;  %v2674_v0 = vrot.slane %v2673_v7, 1 }
 0x2d6   : > { %v2646_v27 = vmax.f32 %v2584_v13, %v2642_v8  ;;  %v2586_v39 = vmax.f32 %v2570_v16, 0.0  ;;  %v2622_v13 = vrot.slane %v2621_v41, 1 }
 0x2d7   : > { %v2675_v33 = vmax.f32 %v2673_v7, %v2674_v0  ;;  %v3788_v7 = vld [vmem:[%s5751_s5 + $0x20] sm:$0xff] }
 0x2d8   : > { %v2574_v51 = vpop.f32.mrb[32].mxu1  ;;  %v2664_v19 = vrot.slane %v2646_v27, %v5040_v21  ;;  %v2692_v1 = vrot.slane %v2586_v39, 7  ;;  %v2623_v55 = vmax.f32 %v2621_v41, %v2622_v13  ;;  %v4369_v13 = vld [vmem:[%s5753_s7 + $0x4] ss:$8 sps:$4 sm:$0xff]  }
 0x2d9   : > { %v2575_v48 = vadd.f32 %v3776_v32, %v2574_v51  ;;  %v4224_v35 = vpop.f32.mrb[33].mxu1  ;;  %v2629_v32 = vrot.slane %v2628_v25, 1 }
 0x2da   : > { %v2665_v54 = vcombine.high %v2664_v19, %v2664_v19  ;;  %v2676_v60 = vsel %vm2616_vm10, %v2664_v19, -inf  ;;  %v2697_v34 = vmax.f32 %v2585_v18, %v2692_v1 }
 0x2db   : > { %v2587_v20 = vmax.f32 %v2575_v48, 0.0  ;;  %v2677_v57 = vrot.slane %v2676_v60, 4  ;;  %v2630_v50 = vmax.f32 %v2628_v25, %v2629_v32  ;;  %v2760_v25 = vld [vmem:[%s5751_s5] sm:$0xff] }
 0x2dc   : > { %v2683_v44 = vsel %vm2616_vm10, %v2665_v54, -inf  ;;  %v2701_v4 = vcombine.high %v2697_v34, %v2697_v34  ;;  %v2761_v54 = vld [vmem:[%s5751_s5 + $0x8] sm:$0xff] }
 0x2dd   : > { %v2693_v10 = vrot.slane %v2587_v20, 7  ;;  %v2579_v31 = vpop.f32.mrb[34].mxu1  ;;  %v2678_v37 = vmax.f32 %v2676_v60, %v2677_v57  ;;  %v2684_v9 = vrot.slane %v2683_v44, 4  ;;  %v2744_v38 = vsel %vm2347_vm5, %v2630_v50, %v2623_v55  ;;  %v3794_v50 = vld [vmem:[%s5752_s6] ss:$0 sm:$0xff] }
 0x2de   : > { %v4227_v17 = vpop.f32.mrb[35].mxu1  ;;  %v2708_v3 = vrot.slane %v2701_v4, %v5040_v21  ;;  %v2745_v27 = vsel %vm2349_vm6, %v2637_v23, %v2744_v38  ;;  %vm2767_vm5 = vcmask 130048   ;;  %v4260_v41 = vpack.c.bf16 %v2761_v54, %v2760_v25  ;;  %v4373_v38 = vld [vmem:[%s5755_s9] ss:$8 sps:$4 sm:$0xff]   ;;  %v4402_v54 = vld [vmem:[%s5755_s9 + $0x94] ss:$8 sps:$4 sm:$0xff]  }
 0x2df   : > { %v2694_v15 = vsel %vm2590_vm7, %v2692_v1, %v2693_v10  ;;  %v2679_v58 = vrot.slane %v2678_v37, 2  ;;  %v2685_v56 = vmax.f32 %v2683_v44, %v2684_v9  ;;  %v3789_v44 = vld [vmem:[%s5751_s5 + $0x28] sm:$0xff]  ;;  %v3791_v9 = vld [vmem:[%s5751_s5 + $0x30] sm:$0xff]  ;;  %v3792_v17 = vld [vmem:[%s5751_s5 + $0x38] sm:$0xff] }
 0x2e0   : > { %v2698_v2 = vmax.f32 %v2586_v39, %v2694_v15  ;;  %v2709_v5 = vcombine.high %v2708_v3, %v2708_v3  ;;  %v2720_v46 = vsel %vm2616_vm10, %v2708_v3, -inf  ;;  %v4263_v31 = vpack.c.bf16 %v3789_v44, %v3788_v7  ;;  %v4367_v15 = vld [vmem:[%s5753_s7] ss:$8 sps:$4 sm:$0xff]   ;;  %v4414_v44 = vld [vmem:[%s5755_s9 + $0xd4] ss:$8 sps:$4 sm:$0xff]  }
 0x2e1   : > { %v2680_v12 = vmax.f32 %v2678_v37, %v2679_v58  ;;  %v2686_v62 = vrot.slane %v2685_v56, 2  ;;  %v2721_v29 = vrot.slane %v2720_v46, 4  ;;  %v4266_v32 = vpack.c.bf16 %v3792_v17, %v3791_v9  ;;  %v4397_v25 = vld [vmem:[%s5755_s9 + $0x80] ss:$8 sps:$4 sm:$0xff]   ;;  %v4418_v9 = vld [vmem:[%s5755_s9 + $0xf0] ss:$8 sps:$4 sm:$0xff]  }
 0x2e2   : > { %v2716_v59 = vrot.slane %v2698_v2, %v5040_v21  ;;  %v2727_v52 = vsel %vm2616_vm10, %v2709_v5, -inf  ;;  %v4450_v58 = vmov 0   ;;  %v4409_v7 = vld [vmem:[%s5755_s9 + $0xc0] ss:$8 sps:$4 sm:$0xff]  }
 0x2e3   : > { %v2681_v63 = vrot.slane %v2680_v12, 1  ;;  %v2687_v36 = vmax.f32 %v2685_v56, %v2686_v62  ;;  %v2722_v26 = vmax.f32 %v2720_v46, %v2721_v29  ;;  %v2728_v47 = vrot.slane %v2727_v52, 4  ;;  %v4375_v56 = vld [vmem:[%s5755_s9 + $0x4] ss:$8 sps:$4 sm:$0xff]  }
 0x2e4   : > { %v2734_v30 = vsel %vm2616_vm10, %v2716_v59, -inf  ;;  %v4421_v17 = vld [vmem:[%s5757_s11 + $0x40] sm:$0xff]  }
 0x2e5   : > { %v2682_v18 = vmax.f32 %v2680_v12, %v2681_v63  ;;  %v2688_v14 = vrot.slane %v2687_v36, 1  ;;  %v2723_v43 = vrot.slane %v2722_v26, 2  ;;  %v2729_v42 = vmax.f32 %v2727_v52, %v2728_v47 }
 0x2e6   : > { %v2735_v6 = vrot.slane %v2734_v30, 4 }
 0x2e7   : > { %v2689_v21 = vmax.f32 %v2687_v36, %v2688_v14  ;;  %v2750_v16 = vsel %vm2353_vm8, %v2682_v18, %v2675_v33  ;;  %v2724_v61 = vmax.f32 %v2722_v26, %v2723_v43  ;;  %v2730_v40 = vrot.slane %v2729_v42, 2 }
 0x2e8   : > { %v2736_v8 = vmax.f32 %v2734_v30, %v2735_v6 }
 0x2e9   : > { %v2751_v39 = vsel %vm2355_vm9, %v2689_v21, %v2750_v16  ;;  %v2725_v53 = vrot.slane %v2724_v61, 1  ;;  %v2731_v49 = vmax.f32 %v2729_v42, %v2730_v40  ;;  %v4378_v21 = vld [vmem:[%s5755_s9 + $0x14] ss:$8 sps:$4 sm:$0xff]   ;;  %v4376_v16 = vld [vmem:[%s5755_s9 + $0x10] ss:$8 sps:$4 sm:$0xff]  }
 0x2ea   : > { %v2758_v51 = vsel %vm2450_vm15, %v2745_v27, %v2751_v39  ;;  %v2737_v24 = vrot.slane %v2736_v8, 2  ;;  %v4379_v40 = vld [vmem:[%s5755_s9 + $0x20] ss:$8 sps:$4 sm:$0xff]   ;;  %v4382_v27 = vld [vmem:[%s5755_s9 + $0x30] ss:$8 sps:$4 sm:$0xff]  }
 0x2eb   : > { %v2732_v19 = vrot.slane %v2731_v49, 1  ;;  %v2726_v48 = vmax.f32 %v2724_v61, %v2725_v53  ;;  %v4381_v61 = vld [vmem:[%s5755_s9 + $0x24] ss:$8 sps:$4 sm:$0xff]   ;;  %v4385_v53 = vld [vmem:[%s5755_s9 + $0x40] ss:$8 sps:$4 sm:$0xff]  }
 0x2ec   : > { %v2738_v1 = vmax.f32 %v2736_v8, %v2737_v24  ;;  %v4384_v8 = vld [vmem:[%s5755_s9 + $0x34] ss:$8 sps:$4 sm:$0xff]   ;;  %v4387_v39 = vld [vmem:[%s5755_s9 + $0x44] ss:$8 sps:$4 sm:$0xff]  }
 0x2ed   : > { %v2733_v35 = vmax.f32 %v2731_v49, %v2732_v19  ;;  %v4390_v49 = vld [vmem:[%s5755_s9 + $0x54] ss:$8 sps:$4 sm:$0xff]   ;;  %v4393_v24 = vld [vmem:[%s5755_s9 + $0x64] ss:$8 sps:$4 sm:$0xff]   ;;  %v4391_v19 = vld [vmem:[%s5755_s9 + $0x60] ss:$8 sps:$4 sm:$0xff]  }
 0x2ee   : > { %v2739_v60 = vrot.slane %v2738_v1, 1 }
 0x2ef   : > { %v2756_v34 = vsel %vm2381_vm12, %v2733_v35, %v2726_v48  ;;  %v4394_v48 = vld [vmem:[%s5755_s9 + $0x70] ss:$8 sps:$4 sm:$0xff]   ;;  %v4399_v35 = vld [vmem:[%s5755_s9 + $0x84] ss:$8 sps:$4 sm:$0xff]  }
 0x2f0   : > { %v2759_v20 = vsel %vm2445_vm13, %v2758_v51, %v2756_v34  ;;  %v2740_v28 = vmax.f32 %v2738_v1, %v2739_v60  ;;  %v4388_v51 = vld [vmem:[%s5755_s9 + $0x50] ss:$8 sps:$4 sm:$0xff]   ;;  %v4396_v1 = vld [vmem:[%s5755_s9 + $0x74] ss:$8 sps:$4 sm:$0xff]   ;;  %v4405_v34 = vld [vmem:[%s5755_s9 + $0xa4] ss:$8 sps:$4 sm:$0xff]  }
 0x2f1   : > { %v2766_v57 = vrot.slane %v2759_v20, 1  ;;  %v2992_v4 = vrot.slane %v2759_v20, 4  ;;  %v2915_v3 = vrot.slane %v2759_v20, 3  ;;  %v4400_v60 = vld [vmem:[%s5755_s9 + $0x90] ss:$8 sps:$4 sm:$0xff]  }
 0x2f2   : > { %v2993_v10 = vrot.slane %v2740_v28, 4  ;;  %v4406_v28 = vld [vmem:[%s5755_s9 + $0xb0] ss:$8 sps:$4 sm:$0xff]  }
 0x2f3   : > { %4233 = vmatmul.mubr.msk.f32.vlgmr.msra.gmra.mrb[36].mxu1 %vm2767_vm5, %v2766_v57  ;;  %v4411_v57 = vld [vmem:[%s5755_s9 + $0xc4] ss:$8 sps:$4 sm:$0xff]  }
 0x2f4   : > { %4261 = vmatpush3.bf16.msra.mxu1 %v4260_v41  ;;  %4239 = vmatprep.mubr.msk.f32.mxu1 %vm4447_vm3, %v5772_v11  ;;  %v2994_v37 = vsel %vm624_vm0, %v2992_v4, %v2993_v10  ;;  %vm3081_vm0 = vcmask 254976   ;;  %v4408_v41 = vld [vmem:[%s5755_s9 + $0xb4] ss:$8 sps:$4 sm:$0xff]   ;;  %v4412_v4 = vld [vmem:[%s5755_s9 + $0xd0] ss:$8 sps:$4 sm:$0xff]  }
 0x2f5   : > { %4262 = vmatprep.subr.bf16.mxu1 %v4449_v22  ;;  %v4415_v10 = vld [vmem:[%s5755_s9 + $0xe0] ss:$8 sps:$4 sm:$0xff]  }
 0x2f7   : > { %4240 = vmatmul.mubr.msk.f32.vlgmr.msra.gmra.mrb[38].mxu1 %vm2767_vm5, %v2759_v20  ;;  %v4403_v20 = vld [vmem:[%s5755_s9 + $0xa0] ss:$8 sps:$4 sm:$0xff]  }
 0x2f8   : > { %4264 = vmatpush3.bf16.msra.mxu1 %v4263_v31  ;;  %4246 = vmatprep.mubr.msk.f32.mxu1 %vm4447_vm3, %v5772_v11  ;;  %v4417_v31 = vld [vmem:[%s5755_s9 + $0xe4] ss:$8 sps:$4 sm:$0xff]  }
 0x2f9   : > { %4265 = vmatprep.subr.bf16.mxu1 %v4449_v22  ;;  %v4372_v22 = vld [vmem:[%s5753_s7 + $0x14] ss:$8 sps:$4 sm:$0xff]  }
 0x2fb   : > { %4247 = vmatmul.mubr.msk.f32.vlgmr.msra.gmra.mrb[40].mxu1 %vm2767_vm5, %v2915_v3 }
 0x2fc   : > { %4267 = vmatpush3.bf16.msra.mxu1 %v4266_v32  ;;  %4253 = vmatprep.mubr.msk.f32.mxu1 %vm4447_vm3, %v5772_v11  ;;  %v4370_v11 = vld [vmem:[%s5753_s7 + $0x10] ss:$8 sps:$4 sm:$0xff]   ;;  %vm3126_vm3 = vcmask 261120  }
 0x2fd   : > { %3130 = vmatprep.subr.bf16.mxu1 %v4369_v13  ;;  %v5780_v32 = vld [vmem:[#allocation4_spill] sm:$0xff] }
 0x2fe   : > { %v3118_v3 = vsub.s32 0, %v5780_v32  ;;  %v3122_v13 = vsub.s32 1, %v5780_v32 }
 0x2ff   : > { %4254 = vmatmul.mubr.msk.f32.vlgmr.msra.gmra.mrb[42].mxu1 %vm2767_vm5, %v2994_v37  ;;  %v4420_v37 = vld [vmem:[%s5755_s9 + $0xf4] ss:$8 sps:$4 sm:$0xff]  }
 0x300   : > { %3162 = vmatprep.mubr.bf16.mxu1 %v4450_v58  ;;  %3131 = vmatpush1.bf16.msra.mxu1 %v4367_v15  ;;  %v3094_v15 = vld [vmem:[%s5754_s8] sm:$0x3] }
 0x301   : > { %3132 = vmatprep.subr.bf16.mxu1 %v4372_v22  ;;  %v3119_v22 = vrot.slane %v3094_v15, %v3118_v3  ;;  %v3123_v58 = vrot.slane %v3094_v15, %v3122_v13 }
 0x304   : > { %3133 = vmatpush1.bf16.msra.mxu1 %v4370_v11 }
 0x305   : > { %3379 = vmatprep.subr.bf16.mxu1 %v4375_v56 }
 0x3c6   : > { %v2836_v2 = vpop.f32.mrb[36].mxu1 }
 0x3c7   : > { %v4234_v45 = vpop.f32.mrb[37].mxu1 }
 0x3ca   : > { %v2908_v0 = vpop.f32.mrb[38].mxu1 }
 0x3cb   : > { %v2909_v5 = vadd.f32 %v2908_v0, %v2836_v2  ;;  %v4241_v46 = vpop.f32.mrb[39].mxu1 }
 0x3ce   : > { %v2984_v12 = vpop.f32.mrb[40].mxu1 }
 0x3cf   : > { %v2988_v62 = vadd.f32 %v2984_v12, %v2909_v5  ;;  %v4248_v29 = vpop.f32.mrb[41].mxu1 }
 0x3d0   : > { %v4422_v29 = vld [vmem:[%s5757_s11] sm:$0xff]  }
 0x3d2   : > { %v3063_v59 = vpop.f32.mrb[42].mxu1 }
 0x3d3   : > { %v3067_v52 = vadd.f32 %v3063_v59, %v2988_v62  ;;  %v4255_v63 = vpop.f32.mrb[43].mxu1 }
 0x3d4   : > { %v4425_v63 = vld [vmem:[%s5757_s11 + $0x50] sm:$0xff]  }
 0x3d5   : > { %v3075_v36 = vadd.f32 %v3794_v50, %v3067_v52  ;;  %v4423_v50 = vld [vmem:[%s5757_s11 + $0x48] sm:$0xff]  }
 0x3d6   : > { %v4424_v52 = vld [vmem:[%s5757_s11 + $0x8] sm:$0xff]  }
 0x3d7   : > { %v3076_v26 = vmax.f32 %v3075_v36, 0.0  ;;  %v4426_v36 = vld [vmem:[%s5757_s11 + $0x10] sm:$0xff]  }
 0x3d9   : > { %v3078_v47 = vrot.slane %v3076_v26, 3 }
 0x3db   : > { %v3080_v55 = vmax.f32 %v3076_v26, %v3078_v47  ;;  %v4427_v26 = vld [vmem:[%s5757_s11 + $0x58] sm:$0xff]  }
 0x3dc   : > { %v4428_v47 = vld [vmem:[%s5757_s11 + $0x18] sm:$0xff]  }
 0x3dd   : > { %v3082_v23 = vsel %vm3081_vm0, %v3080_v55, -inf  ;;  %v4429_v55 = vld [vmem:[%s5757_s11 + $0x60] sm:$0xff]  }
 0x3de   : > { %v3083_v33 = vrot.slane %v3082_v23, 4 }
 0x3e0   : > { %v3084_v30 = vmax.f32 %v3082_v23, %v3083_v33  ;;  %v4430_v23 = vld [vmem:[%s5757_s11 + $0x20] sm:$0xff]   ;;  %v4431_v33 = vld [vmem:[%s5757_s11 + $0x68] sm:$0xff]  }
 0x3e2   : > { %v3085_v18 = vrot.slane %v3084_v30, 2 }
 0x3e4   : > { %v3086_v14 = vmax.f32 %v3084_v30, %v3085_v18  ;;  %v4432_v30 = vld [vmem:[%s5757_s11 + $0x28] sm:$0xff]   ;;  %v4437_v18 = vld [vmem:[%s4546_s17 + $0xf8] sm:$0xff] }
 0x3e6   : > { %v3087_v43 = vrot.slane %v3086_v14, 1 }
 0x3e8   : > { %v3088_v42 = vmax.f32 %v3086_v14, %v3087_v43  ;;  %v1373_v14 = vrot.slane %v4437_v18, 1  ;;  %v4433_v43 = vld [vmem:[%s5757_s11 + $0x70] sm:$0xff]  }
 0x3ea   : > { %v3089_v6 = vpack.c.bf16 %v3088_v42, %v3088_v42  ;;  %v4434_v42 = vld [vmem:[%s5757_s11 + $0x30] sm:$0xff]  }
 0x3ec   : > { %3799 = vmatmul.mubr.msk.bf16.vlgmr.msra.gmra.mrb[44].mxu1 %vm3126_vm3, %v3089_v6  ;;  %v4436_v6 = vld [vmem:[%s5757_s11 + $0x38] sm:$0xff]  }
 0x3ed   : > { %3380 = vmatpush1.bf16.msra.mxu1 %v4373_v38  ;;  %v4435_v38 = vld [vmem:[%s5757_s11 + $0x78] sm:$0xff]  }
 0x3ee   : > { %3381 = vmatprep.subr.bf16.mxu1 %v4378_v21  ;;  %v5781_v21 = vld [vmem:[#allocation2_spill] sm:$0xff] }
 0x3f1   : > { %3382 = vmatpush1.bf16.msra.mxu1 %v4376_v16  ;;  %v5782_v16 = vrot.slane %v5781_v21, 1 }
 0x3f2   : > { %3383 = vmatprep.subr.bf16.mxu1 %v4381_v61 }
 0x3f3   : > { %v1374_v61 = vsel %vm503_vm1, %v5782_v16, %v1373_v14 }
 0x3f4   : > { %4202 = vmatprep.mubr.msk.f32.mxu0 %vm563_vm2, %v1374_v61 }
 0x3f5   : > { %3384 = vmatpush1.bf16.msra.mxu1 %v4379_v40  ;;  %4203 = vmatmul.mubr.msk.f32.gmra.mrb[32].mxu0 %vm563_vm2, %v1373_v14  ;;  %v3207_v40 = vld [vmem:[%s5756_s10] sm:$0x3] }
 0x3f6   : > { %3385 = vmatprep.subr.bf16.mxu1 %v4384_v8  ;;  %v3372_v8 = vrot.slane %v3207_v40, %v3118_v3 }
 0x3f9   : > { %3386 = vmatpush1.bf16.msra.mxu1 %v4382_v27  ;;  %v3376_v27 = vrot.slane %v3207_v40, %v3122_v13 }
 0x3fa   : > { %3387 = vmatprep.subr.bf16.mxu1 %v4387_v39 }
 0x3fd   : > { %3388 = vmatpush1.bf16.msra.mxu1 %v4385_v53 }
 0x3fe   : > { %3389 = vmatprep.subr.bf16.mxu1 %v4390_v49 }
 0x401   : > { %3390 = vmatpush1.bf16.msra.mxu1 %v4388_v51 }
 0x402   : > { %3391 = vmatprep.subr.bf16.mxu1 %v4393_v24 }
 0x405   : > { %3392 = vmatpush1.bf16.msra.mxu1 %v4391_v19 }
 0x406   : > { %3393 = vmatprep.subr.bf16.mxu1 %v4396_v1 }
 0x409   : > { %3394 = vmatpush1.bf16.msra.mxu1 %v4394_v48 }
 0x40a   : > { %3395 = vmatprep.subr.bf16.mxu1 %v4399_v35 }
 0x40d   : > { %3396 = vmatpush1.bf16.msra.mxu1 %v4397_v25 }
 0x40e   : > { %3397 = vmatprep.subr.bf16.mxu1 %v4402_v54 }
 0x411   : > { %3398 = vmatpush1.bf16.msra.mxu1 %v4400_v60 }
 0x412   : > { %3399 = vmatprep.subr.bf16.mxu1 %v4405_v34 }
 0x415   : > { %3400 = vmatpush1.bf16.msra.mxu1 %v4403_v20  ;;  %v3456_v20 = vld [vmem:[%s5758_s12] sm:$0x1] }
 0x416   : > { %3401 = vmatprep.subr.bf16.mxu1 %v4408_v41 }
 0x419   : > { %3402 = vmatpush1.bf16.msra.mxu1 %v4406_v28 }
 0x41a   : > { %3403 = vmatprep.subr.bf16.mxu1 %v4411_v57 }
 0x41d   : > { %3404 = vmatpush1.bf16.msra.mxu1 %v4409_v7 }
 0x41e   : > { %3405 = vmatprep.subr.bf16.mxu1 %v4414_v44 }
 0x421   : > { %3406 = vmatpush1.bf16.msra.mxu1 %v4412_v4 }
 0x422   : > { %3407 = vmatprep.subr.bf16.mxu1 %v4417_v31 }
 0x425   : > { %3408 = vmatpush1.bf16.msra.mxu1 %v4415_v10 }
 0x426   : > { %3409 = vmatprep.subr.bf16.mxu1 %v4420_v37 }
 0x429   : > { %3410 = vmatpush1.bf16.msra.mxu1 %v4418_v9 }
 0x42a   : > { %3995 = vmatprep.subr.bf16.mxu1 %v4421_v17 }
 0x4bf   : > { %v3164_v11 = vpop.f32.mrb[44].mxu1 }
 0x4c0   : > { %v3165_v56 = vadd.f32 %v3164_v11, %v3119_v22  ;;  %v3166_v2 = vpop.f32.mrb[45].mxu1 }
 0x4c1   : > { %v3167_v45 = vadd.f32 %v3166_v2, %v3123_v58  ;;  %v3168_v0 = vpop.f32.mrb[46].mxu1 }
 0x4c2   : > { %v3171_v5 = vmax.f32 %v3165_v56, 0.0  ;;  %v3169_v46 = vpop.f32.mrb[47].mxu1 }
 0x4c3   : > { %v3172_v12 = vmax.f32 %v3167_v45, 0.0 }
 0x4c4   : > { %v3173_v59 = vpack.c.bf16 %v3171_v5, %v3171_v5 }
 0x4c5   : > { %v3174_v62 = vpack.c.bf16 %v3172_v12, %v3172_v12 }
 0x4c7   : > { %3411 = vmatprep.mubr.bf16.mxu1 %v3174_v62 }
 0x4c8   : > { %3412 = vmatmul.mubr.bf16.vlgmr.msra.gmra.mrb[48].mxu1 %v3173_v59  ;;  %v4204_v54 = vpop.f32.mrb[32].mxu0 }
 0x4c9   : > { %3996 = vmatpush3.bf16.msra.mxu1 %v4422_v29  ;;  %v1590_v60 = vpop.f32.mrb[33].mxu0 }
 0x4ca   : > { %3997 = vmatprep.subr.bf16.mxu1 %v4423_v50 }
 0x4cd   : > { %3998 = vmatpush3.bf16.msra.mxu1 %v4424_v52 }
 0x4ce   : > { %3999 = vmatprep.subr.bf16.mxu1 %v4425_v63 }
 0x4d1   : > { %4000 = vmatpush3.bf16.msra.mxu1 %v4426_v36 }
 0x4d2   : > { %4001 = vmatprep.subr.bf16.mxu1 %v4427_v26 }
 0x4d5   : > { %4002 = vmatpush3.bf16.msra.mxu1 %v4428_v47 }
 0x4d6   : > { %4003 = vmatprep.subr.bf16.mxu1 %v4429_v55 }
 0x4d9   : > { %4004 = vmatpush3.bf16.msra.mxu1 %v4430_v23 }
 0x4da   : > { %4005 = vmatprep.subr.bf16.mxu1 %v4431_v33 }
 0x4dd   : > { %4006 = vmatpush3.bf16.msra.mxu1 %v4432_v30 }
 0x4de   : > { %4007 = vmatprep.subr.bf16.mxu1 %v4433_v43 }
 0x4e1   : > { %4008 = vmatpush3.bf16.msra.mxu1 %v4434_v42 }
 0x4e2   : > { %4009 = vmatprep.subr.bf16.mxu1 %v4435_v38 }
 0x4e5   : > { %4010 = vmatpush3.bf16.msra.mxu1 %v4436_v6 }
 0x59b   : > { %v3413_v39 = vpop.f32.mrb[48].mxu1 }
 0x59c   : > { %v3414_v53 = vadd.f32 %v3413_v39, %v3372_v8  ;;  %v3415_v49 = vpop.f32.mrb[49].mxu1 }
 0x59d   : > { %v3416_v51 = vadd.f32 %v3415_v49, %v3376_v27  ;;  %v3417_v24 = vpop.f32.mrb[50].mxu1 }
 0x59e   : > { %v3420_v19 = vmax.f32 %v3414_v53, 0.0  ;;  %v3418_v1 = vpop.f32.mrb[51].mxu1 }
 0x59f   : > { %v3421_v48 = vmax.f32 %v3416_v51, 0.0 }
 0x5a0   : > { %v3422_v25 = vpack.c.bf16 %v3420_v19, %v3420_v19 }
 0x5a1   : > { %v3423_v35 = vpack.c.bf16 %v3421_v48, %v3421_v48 }
 0x5a3   : > { %3585 = vmatprep.mubr.bf16.mxu1 %v3423_v35 }
 0x5a4   : > { %3586 = vmatmul.mubr.bf16.vlgmr.msra.gmra.mrb[52].mxu1 %v3422_v25 }
 0x677   : > { %v4011_v34 = vpop.f32.mrb[52].mxu1 }
 0x678   : > { %v4012_v41 = vpop.f32.mrb[53].mxu1 }
 0x679   : > { %v4013_v28 = vadd.f32 %v4012_v41, %v4011_v34  ;;  %v4014_v57 = vpop.f32.mrb[54].mxu1 }
 0x67a   : > { %v4015_v7 = vpop.f32.mrb[55].mxu1 }
 0x67b   : > { %v3588_v44 = vadd.f32 %v4013_v28, %v3456_v20 }
 0x67d   : > { %3593 = vst [vmem:[%s436_s16] sm:$0x1] %v3588_v44 }
 0x67e PF: > { %s23_s25 = sadd.s32 1, %s4444_s25  }
 0x67f   : > { %p20_p4 = scmp.ge.s32.totalorder %s23_s25, 4  }
 0x681   :  { %22 = sbr.rel (!%p20_p4) target bundleno = 1 (0x1), region = 108 }

</bundles_post_ra>
